<compile_context>
chip_gen: v6e
topology: v6e:2x2x1
jax: 0.10.0
libtpu: 0.0.40
codegen_flags: <defaults>
</compile_context>

<pallas_src>
import functools
import math

import jax
import jax.numpy as jnp
from jax.experimental import pallas as pl
from jax.experimental.pallas import tpu as pltpu


def _mha_kernel(xT_ref, xTq_ref, wkvT_ref, wqgT_ref, bgT_ref, woT_ref, boT_ref,
                cosT_ref, sinT_ref, cosq_ref, sinq_ref, outT_ref,
                k_scr, v_scr, *, n_head, c, softmax_dtype):
    f32 = jnp.float32
    bf16 = jnp.bfloat16
    hc = n_head * c

    # ---- once per batch element (first query tile): project K and V, apply
    # ---- rotary, stash (H, c, S) bf16 copies in VMEM scratch -----------------
    @pl.when(pl.program_id(1) == 0)
    def _project_kv():
        xT = xT_ref[0]                                          # (c_in, S) bf16
        S = xT.shape[1]
        # Fused [K | rot-src(K) | V] projection (rotate_half folded into rows).
        proj = jnp.dot(wkvT_ref[...], xT, preferred_element_type=f32)  # (3hc, S)
        cosS = cosT_ref[...][None]                              # (1, c, S)
        sinS = sinT_ref[...][None]
        k_a = proj[0 * hc:1 * hc].reshape(n_head, c, S)
        k_b = proj[1 * hc:2 * hc].reshape(n_head, c, S)
        k_scr[...] = (k_a * cosS + k_b * sinS).astype(bf16)     # rotary-embedded K
        v_scr[...] = proj[2 * hc:3 * hc].reshape(n_head, c, S).astype(bf16)

    # ---- per query tile ------------------------------------------------------
    xq = xTq_ref[0]                                             # (c_in, tq) bf16
    tq = xq.shape[1]
    # Fused [Q*scale | rot-src(Q)*scale | gate] projection for this query tile.
    projq = jnp.dot(wqgT_ref[...], xq, preferred_element_type=f32)      # (3hc, tq)
    cq = cosq_ref[...][None]                                    # (1, c, tq)
    sq = sinq_ref[...][None]
    q_a = projq[0 * hc:1 * hc].reshape(n_head, c, tq)
    q_b = projq[1 * hc:2 * hc].reshape(n_head, c, tq)
    qT3 = q_a * cq + q_b * sq                                   # (H, c, tq), scaled
    gT = jax.nn.sigmoid(projq[2 * hc:3 * hc] + bgT_ref[...])    # (hc, tq) gate

    # Small per-tile transpose (H*c*tq elems, ~3% of the per-tile XLU softmax
    # reduction work) so both attention dots are canonical batched MXU forms.
    q3 = jnp.swapaxes(qT3, 1, 2).astype(bf16)                   # (H, tq, c)

    kT3 = k_scr[...]                                            # (H, c, S) bf16
    vT3 = v_scr[...]                                            # (H, c, S) bf16

    # scores[h, q, k] over the full key range.
    a = jax.lax.dot_general(q3, kT3, (((2,), (1,)), ((0,), (0,))),
                            preferred_element_type=f32)         # (H, tq, S) f32

    # Numerically-stable exp; normalization deferred past the PV matmul.
    # On v6e/v7x softmax_dtype is bf16 (bf16 VPU/EUP); f32 on v5e.
    m = jnp.max(a, axis=-1, keepdims=True)
    p = jnp.exp((a - m).astype(softmax_dtype))                  # (H, tq, S)

    # oT3[h, c, q] = sum_k v[h, c, k] * p[h, q, k]
    oT3 = jax.lax.dot_general(vT3, p.astype(bf16), (((2,), (2,)), ((0,), (0,))),
                              preferred_element_type=f32)       # (H, c, tq) f32

    # Deferred softmax normalization: only H*tq reciprocals (EUP, approx).
    denom = jnp.sum(p, axis=-1).astype(f32)                     # (H, tq)
    inv = pl.reciprocal(denom, approx=True)[:, None, :]         # (H, 1, tq)
    oT = (oT3 * inv).reshape(hc, tq) * gT                       # gated, (hc, tq)

    # Output projection (transposed): (c_in, hc) @ (hc, tq) + (c_in, 1).
    outT = jnp.dot(woT_ref[...], oT.astype(bf16),
                   preferred_element_type=f32) + boT_ref[...]
    outT_ref[0] = outT.astype(outT_ref.dtype)

    # TODO(synk): is_global=True branch (shared single-head KV, mean-pooled q),
    # the optional additive bias / attention_mask, and attn_dim != -2 (handled
    # by a host-side moveaxis) are not implemented here.


def _rotate_half_matrix(c, n_head):
    """(hc, hc) block-diagonal matrix P with rotate_half(y) == y @ P per head."""
    half = c // 2
    eye = jnp.eye(half, dtype=jnp.float32)
    P = jnp.zeros((c, c), jnp.float32)
    P = P.at[half:, :half].set(-eye)
    P = P.at[:half, half:].set(eye)
    return jnp.kron(jnp.eye(n_head, dtype=jnp.float32), P)


def _bf16_softmax_default():
    # bf16 VPU/EUP exists on v6e / v7x; keep f32 softmax math elsewhere (v5e etc.).
    try:
        kind = jax.devices()[0].device_kind.lower()
    except Exception:
        return False
    return any(t in kind for t in ("v6", "v7", "7x"))


def _vmem_limit_bytes():
    try:
        cap = int(pltpu.get_tpu_info().vmem_capacity_bytes)
    except Exception:
        cap = 64 * 1024 * 1024                     # conservative (v7x-sized) fallback
    # ~48 MiB on v7x (64 MiB physical), ~96 MiB on v5e/v6e (128 MiB physical).
    return min(100 * 1024 * 1024, (cap * 3) // 4)


def _pick_query_tile(S, n_head, softmax_bytes, vmem_limit):
    # Live per-tile softmax footprint per query row: f32 scores + exp'd p
    # (+ a bf16 copy for the PV matmul when p stays f32).
    per_row = n_head * S * (4 + softmax_bytes + (2 if softmax_bytes == 4 else 0))
    budget = int(vmem_limit * 0.4)
    tq = 1024
    while tq >= 128:
        if S % tq == 0 and tq * per_row <= budget:
            return tq
        tq //= 2
    return 128 if S % 128 == 0 else S              # tiny / ragged S: single tile


def multi_head_attention(x, params, cos, sin, *, n_head, c,
                         softmax_in_bf16=None, single_buffer_consts=True):
    """Gated Evoformer MHA forward (attn_dim == -2, no bias/mask, not global).

    x: (B, S, c_in) f32.  params = (wq, wk, wv, wg, bg, wo, bo) in the
    math convention y = x @ w + b.  cos/sin: (S, c) rotary tables.
    """
    B, S, c_in = x.shape
    wq, wk, wv, wg, bg, wo, bo = params
    hc = n_head * c
    scale = 1.0 / math.sqrt(c)
    f32 = jnp.float32
    bf16 = jnp.bfloat16

    if softmax_in_bf16 is None:
        softmax_in_bf16 = _bf16_softmax_default()
    softmax_dtype = bf16 if softmax_in_bf16 else f32

    vmem_limit = _vmem_limit_bytes()
    tq = _pick_query_tile(S, n_head, 2 if softmax_in_bf16 else 4, vmem_limit)
    num_q = S // tq

    # Fold rotate_half (as a right-multiplied permutation matrix) and the
    # 1/sqrt(c) query scale into the projection weights on the host.
    P_full = _rotate_half_matrix(c, n_head)                       # (hc, hc)
    w_qg = jnp.concatenate([wq * scale, (wq @ P_full) * scale, wg], axis=1)
    w_kv = jnp.concatenate([wk, wk @ P_full, wv], axis=1)
    w_qgT = w_qg.T.astype(bf16)                                   # (3hc, c_in)
    w_kvT = w_kv.T.astype(bf16)                                   # (3hc, c_in)
    woT = wo.T.astype(bf16)                                       # (c_in, hc)
    bgT = bg.reshape(hc, 1).astype(f32)                           # (hc, 1)
    boT = bo.reshape(c_in, 1).astype(f32)                         # (c_in, 1)
    cosT = cos.T.astype(f32)                                      # (c, S), shared by all heads
    sinT = sin.T.astype(f32)
    xT = jnp.swapaxes(x, -1, -2).astype(bf16)                     # (B, c_in, S)

    kernel = functools.partial(_mha_kernel, n_head=n_head, c=c,
                               softmax_dtype=softmax_dtype)

    def const_spec(shape):
        n = len(shape)

        def idx(b, qi):
            return (0,) * n

        if single_buffer_consts:
            # Grid-invariant operand: single-buffer it (no pipelining needed).
            return pl.BlockSpec(shape, idx, pipeline_mode=pl.Buffered(1))
        return pl.BlockSpec(shape, idx)

    in_specs = [
        pl.BlockSpec((1, c_in, S), lambda b, qi: (b, 0, 0)),      # x^T full (K/V proj @ qi==0)
        pl.BlockSpec((1, c_in, tq), lambda b, qi: (b, 0, qi)),    # x^T query tile
        const_spec((3 * hc, c_in)),                               # fused K/V weights^T
        const_spec((3 * hc, c_in)),                               # fused Q/gate weights^T
        const_spec((hc, 1)),                                      # gate bias^T
        const_spec((c_in, hc)),                                   # Wo^T
        const_spec((c_in, 1)),                                    # bo^T
        const_spec((c, S)),                                       # cos^T full (for K rotary)
        const_spec((c, S)),                                       # sin^T full
        pl.BlockSpec((c, tq), lambda b, qi: (0, qi)),             # cos^T query tile
        pl.BlockSpec((c, tq), lambda b, qi: (0, qi)),             # sin^T query tile
    ]

    outT = pl.pallas_call(
        kernel,
        out_shape=jax.ShapeDtypeStruct((B, c_in, S), jnp.float32),
        grid=(B, num_q),
        in_specs=in_specs,
        out_specs=pl.BlockSpec((1, c_in, tq), lambda b, qi: (b, 0, qi)),
        scratch_shapes=[pltpu.VMEM((n_head, c, S), bf16),         # rotary-embedded K
                        pltpu.VMEM((n_head, c, S), bf16)],        # V
        compiler_params=pltpu.CompilerParams(
            # q-tile axis must stay "arbitrary": it reuses the K/V scratch
            # written at qi==0 of the same batch element.
            dimension_semantics=("parallel", "arbitrary"),
            vmem_limit_bytes=vmem_limit),
    )(xT, xT, w_kvT, w_qgT, bgT, woT, boT, cosT, sinT, cosT, sinT)

    return jnp.swapaxes(outT, -1, -2)                             # (B, S, c_in)


# ----------------------- pure-JAX reference (for checking) -----------------------
def _rotate_half_nd(x):
    half = x.shape[-1] // 2
    return jnp.concatenate([-x[..., half:], x[..., :half]], axis=-1)


def mha_reference(x, params, cos, sin, *, n_head, c):
    wq, wk, wv, wg, bg, wo, bo = params
    B, S, c_in = x.shape
    q = (x @ wq).reshape(B, S, n_head, c).transpose(0, 2, 1, 3)   # (B,H,S,c)
    k = (x @ wk).reshape(B, S, n_head, c).transpose(0, 2, 1, 3)
    v = (x @ wv).reshape(B, S, n_head, c).transpose(0, 2, 1, 3)
    q = q * cos + _rotate_half_nd(q) * sin
    k = k * cos + _rotate_half_nd(k) * sin
    q = q / math.sqrt(c)
    a = jnp.einsum('bhqc,bhkc->bhqk', q, k)
    a = jax.nn.softmax(a, axis=-1)
    o = jnp.einsum('bhqk,bhkc->bhqc', a, v)
    o = o.transpose(0, 2, 1, 3).reshape(B, S, n_head * c)
    g = jax.nn.sigmoid(x @ wg + bg)
    o = g * o
    return o @ wo + bo


if __name__ == "__main__":
    B, S, c_in, c, n_head = 2, 8, 32, 8, 4   # small evoformer-like config

    key = jax.random.PRNGKey(0)
    keys = jax.random.split(key, 8)
    s = 0.1
    x = jax.random.normal(keys[0], (B, S, c_in), jnp.float32)
    wq = jax.random.normal(keys[1], (c_in, n_head * c), jnp.float32) * s
    wk = jax.random.normal(keys[2], (c_in, n_head * c), jnp.float32) * s
    wv = jax.random.normal(keys[3], (c_in, n_head * c), jnp.float32) * s
    wg = jax.random.normal(keys[4], (c_in, n_head * c), jnp.float32) * s
    bg = jax.random.normal(keys[5], (1, n_head * c), jnp.float32) * s
    wo = jax.random.normal(keys[6], (n_head * c, c_in), jnp.float32) * s
    bo = jax.random.normal(keys[7], (1, c_in), jnp.float32) * s
    params = (wq, wk, wv, wg, bg, wo, bo)

    # RotaryEmbedding(c): inv_freq = 1/10000^(2i/c), emb = cat(freqs, freqs).
    inv_freq = 1.0 / (10000.0 ** (jnp.arange(0, c, 2, dtype=jnp.float32) / c))
    t = jnp.arange(S, dtype=jnp.float32)
    freqs = jnp.einsum('i,j->ij', t, inv_freq)                    # (S, c/2)
    emb = jnp.concatenate([freqs, freqs], axis=-1)                # (S, c)
    cos, sin = jnp.cos(emb), jnp.sin(emb)

    try:
        out = jax.block_until_ready(
            multi_head_attention(x, params, cos, sin, n_head=n_head, c=c))
    except Exception:
        # Fallback if single-buffered (pl.Buffered(1)) constant operands are not
        # supported by the installed Pallas version; everything else unchanged.
        out = jax.block_until_ready(
            multi_head_attention(x, params, cos, sin, n_head=n_head, c=c,
                                 single_buffer_consts=False))

    ref = mha_reference(x, params, cos, sin, n_head=n_head, c=c)
    assert out.shape == (B, S, c_in)
    max_err = float(jnp.max(jnp.abs(out - ref)))
    assert jnp.allclose(out, ref, atol=2e-2, rtol=2e-2), f"max_err={max_err}"
    print("KERNEL_OK")
</pallas_src>

<mosaic_0001>
module attributes {stable_mosaic.version = 11 : i64} {
  func.func @_mha_kernel(%arg0: i32, %arg1: i32, %arg2: memref<1x32x8xbf16, #tpu.memory_space<vmem>>, %arg3: memref<1x32x8xbf16, #tpu.memory_space<vmem>>, %arg4: memref<96x32xbf16, #tpu.memory_space<vmem>>, %arg5: memref<96x32xbf16, #tpu.memory_space<vmem>>, %arg6: memref<32x1xf32, #tpu.memory_space<vmem>>, %arg7: memref<32x32xbf16, #tpu.memory_space<vmem>>, %arg8: memref<32x1xf32, #tpu.memory_space<vmem>>, %arg9: memref<8x8xf32, #tpu.memory_space<vmem>>, %arg10: memref<8x8xf32, #tpu.memory_space<vmem>>, %arg11: memref<8x8xf32, #tpu.memory_space<vmem>>, %arg12: memref<8x8xf32, #tpu.memory_space<vmem>>, %arg13: memref<1x32x8xf32, #tpu.memory_space<vmem>>, %arg14: memref<4x8x8xbf16, #tpu.memory_space<vmem>>, %arg15: memref<4x8x8xbf16, #tpu.memory_space<vmem>>) attributes {dimension_semantics = [#tpu.dimension_semantics<parallel>, #tpu.dimension_semantics<arbitrary>], iteration_bounds = array<i64: 2, 1>, scalar_prefetch = 0 : i64, scratch_operands = 2 : i64, tpu.core_type = #tpu.core_type<tc>, window_params = [{transform_indices = @transform_0, window_bounds = array<i64: 1, 32, 8>}, {transform_indices = @transform_1, window_bounds = array<i64: 1, 32, 8>}, {pipeline_mode = #tpu.pipeline_mode<synchronous>, transform_indices = @transform_2, window_bounds = array<i64: 96, 32>}, {pipeline_mode = #tpu.pipeline_mode<synchronous>, transform_indices = @transform_3, window_bounds = array<i64: 96, 32>}, {pipeline_mode = #tpu.pipeline_mode<synchronous>, transform_indices = @transform_4, window_bounds = array<i64: 32, 1>}, {pipeline_mode = #tpu.pipeline_mode<synchronous>, transform_indices = @transform_5, window_bounds = array<i64: 32, 32>}, {pipeline_mode = #tpu.pipeline_mode<synchronous>, transform_indices = @transform_6, window_bounds = array<i64: 32, 1>}, {pipeline_mode = #tpu.pipeline_mode<synchronous>, transform_indices = @transform_7, window_bounds = array<i64: 8, 8>}, {pipeline_mode = #tpu.pipeline_mode<synchronous>, transform_indices = @transform_8, window_bounds = array<i64: 8, 8>}, {transform_indices = @transform_9, window_bounds = array<i64: 8, 8>}, {transform_indices = @transform_10, window_bounds = array<i64: 8, 8>}, {transform_indices = @transform_11, window_bounds = array<i64: 1, 32, 8>}]} {
    %c0_i32 = arith.constant 0 : i32
    %0 = arith.cmpi eq, %arg1, %c0_i32 : i32
    %1 = arith.extui %0 : i1 to i32
    %c0_i32_0 = arith.constant 0 : i32
    %2 = arith.cmpi ne, %1, %c0_i32_0 : i32
    scf.if %2 {
      %c0_30 = arith.constant 0 : index
      %c0_31 = arith.constant 0 : index
      %c0_32 = arith.constant 0 : index
      %57 = vector.load %arg2[%c0_30, %c0_31, %c0_32] : memref<1x32x8xbf16, #tpu.memory_space<vmem>>, vector<1x32x8xbf16>
      %58 = vector.shape_cast %57 : vector<1x32x8xbf16> to vector<32x8xbf16>
      %c0_33 = arith.constant 0 : index
      %c0_34 = arith.constant 0 : index
      %59 = vector.load %arg4[%c0_33, %c0_34] : memref<96x32xbf16, #tpu.memory_space<vmem>>, vector<96x32xbf16>
      %cst_35 = arith.constant dense<0.000000e+00> : vector<96x8xf32>
      %60 = tpu.matmul %59, %58, %cst_35 {dimension_numbers = #tpu.dot_dimension_numbers<[1], [0], [0], [1], [0, 0, 1, 1], [], []>} : vector<96x32xbf16>, vector<32x8xbf16>, vector<96x8xf32> -> vector<96x8xf32>
      %c0_36 = arith.constant 0 : index
      %c0_37 = arith.constant 0 : index
      %61 = vector.load %arg9[%c0_36, %c0_37] : memref<8x8xf32, #tpu.memory_space<vmem>>, vector<8x8xf32>
      %62 = vector.shape_cast %61 : vector<8x8xf32> to vector<1x8x8xf32>
      %c0_38 = arith.constant 0 : index
      %c0_39 = arith.constant 0 : index
      %63 = vector.load %arg10[%c0_38, %c0_39] : memref<8x8xf32, #tpu.memory_space<vmem>>, vector<8x8xf32>
      %64 = vector.shape_cast %63 : vector<8x8xf32> to vector<1x8x8xf32>
      %65 = vector.extract_strided_slice %60 {offsets = [0, 0], sizes = [32, 8], strides = [1, 1]} : vector<96x8xf32> to vector<32x8xf32>
      %66 = vector.shape_cast %65 : vector<32x8xf32> to vector<4x8x8xf32>
      %67 = vector.extract_strided_slice %60 {offsets = [32, 0], sizes = [32, 8], strides = [1, 1]} : vector<96x8xf32> to vector<32x8xf32>
      %68 = vector.shape_cast %67 : vector<32x8xf32> to vector<4x8x8xf32>
      %69 = vector.broadcast %62 : vector<1x8x8xf32> to vector<4x8x8xf32>
      %70 = arith.mulf %66, %69 : vector<4x8x8xf32>
      %71 = vector.broadcast %64 : vector<1x8x8xf32> to vector<4x8x8xf32>
      %72 = arith.mulf %68, %71 : vector<4x8x8xf32>
      %73 = arith.addf %70, %72 : vector<4x8x8xf32>
      %74 = arith.truncf %73 : vector<4x8x8xf32> to vector<4x8x8xbf16>
      %c0_40 = arith.constant 0 : index
      %c0_41 = arith.constant 0 : index
      %c0_42 = arith.constant 0 : index
      %75 = vector.load %arg14[%c0_40, %c0_41, %c0_42] : memref<4x8x8xbf16, #tpu.memory_space<vmem>>, vector<4x8x8xbf16>
      tpu.vector_store %arg14[%c0_40, %c0_41, %c0_42], %74 {strides = array<i32>} : memref<4x8x8xbf16, #tpu.memory_space<vmem>>, vector<4x8x8xbf16>,
      %76 = vector.extract_strided_slice %60 {offsets = [64, 0], sizes = [32, 8], strides = [1, 1]} : vector<96x8xf32> to vector<32x8xf32>
      %77 = vector.shape_cast %76 : vector<32x8xf32> to vector<4x8x8xf32>
      %78 = arith.truncf %77 : vector<4x8x8xf32> to vector<4x8x8xbf16>
      %c0_43 = arith.constant 0 : index
      %c0_44 = arith.constant 0 : index
      %c0_45 = arith.constant 0 : index
      %79 = vector.load %arg15[%c0_43, %c0_44, %c0_45] : memref<4x8x8xbf16, #tpu.memory_space<vmem>>, vector<4x8x8xbf16>
      tpu.vector_store %arg15[%c0_43, %c0_44, %c0_45], %78 {strides = array<i32>} : memref<4x8x8xbf16, #tpu.memory_space<vmem>>, vector<4x8x8xbf16>,
    } else {
    }
    %c0 = arith.constant 0 : index
    %c0_1 = arith.constant 0 : index
    %c0_2 = arith.constant 0 : index
    %3 = vector.load %arg3[%c0, %c0_1, %c0_2] : memref<1x32x8xbf16, #tpu.memory_space<vmem>>, vector<1x32x8xbf16>
    %4 = vector.shape_cast %3 : vector<1x32x8xbf16> to vector<32x8xbf16>
    %c0_3 = arith.constant 0 : index
    %c0_4 = arith.constant 0 : index
    %5 = vector.load %arg5[%c0_3, %c0_4] : memref<96x32xbf16, #tpu.memory_space<vmem>>, vector<96x32xbf16>
    %cst = arith.constant dense<0.000000e+00> : vector<96x8xf32>
    %6 = tpu.matmul %5, %4, %cst {dimension_numbers = #tpu.dot_dimension_numbers<[1], [0], [0], [1], [0, 0, 1, 1], [], []>} : vector<96x32xbf16>, vector<32x8xbf16>, vector<96x8xf32> -> vector<96x8xf32>
    %c0_5 = arith.constant 0 : index
    %c0_6 = arith.constant 0 : index
    %7 = vector.load %arg11[%c0_5, %c0_6] : memref<8x8xf32, #tpu.memory_space<vmem>>, vector<8x8xf32>
    %8 = vector.shape_cast %7 : vector<8x8xf32> to vector<1x8x8xf32>
    %c0_7 = arith.constant 0 : index
    %c0_8 = arith.constant 0 : index
    %9 = vector.load %arg12[%c0_7, %c0_8] : memref<8x8xf32, #tpu.memory_space<vmem>>, vector<8x8xf32>
    %10 = vector.shape_cast %9 : vector<8x8xf32> to vector<1x8x8xf32>
    %11 = vector.extract_strided_slice %6 {offsets = [0, 0], sizes = [32, 8], strides = [1, 1]} : vector<96x8xf32> to vector<32x8xf32>
    %12 = vector.shape_cast %11 : vector<32x8xf32> to vector<4x8x8xf32>
    %13 = vector.extract_strided_slice %6 {offsets = [32, 0], sizes = [32, 8], strides = [1, 1]} : vector<96x8xf32> to vector<32x8xf32>
    %14 = vector.shape_cast %13 : vector<32x8xf32> to vector<4x8x8xf32>
    %15 = vector.broadcast %8 : vector<1x8x8xf32> to vector<4x8x8xf32>
    %16 = arith.mulf %12, %15 : vector<4x8x8xf32>
    %17 = vector.broadcast %10 : vector<1x8x8xf32> to vector<4x8x8xf32>
    %18 = arith.mulf %14, %17 : vector<4x8x8xf32>
    %19 = arith.addf %16, %18 : vector<4x8x8xf32>
    %20 = vector.extract_strided_slice %6 {offsets = [64, 0], sizes = [32, 8], strides = [1, 1]} : vector<96x8xf32> to vector<32x8xf32>
    %c0_9 = arith.constant 0 : index
    %c0_10 = arith.constant 0 : index
    %21 = vector.load %arg6[%c0_9, %c0_10] : memref<32x1xf32, #tpu.memory_space<vmem>>, vector<32x1xf32>
    %22 = vector.broadcast %21 : vector<32x1xf32> to vector<32x8xf32>
    %23 = arith.addf %20, %22 : vector<32x8xf32>
    %24 = arith.negf %23 : vector<32x8xf32>
    %25 = math.exp %24 : vector<32x8xf32>
    %cst_11 = arith.constant 1.000000e+00 : f32
    %26 = vector.broadcast %cst_11 : f32 to vector<32x8xf32>
    %27 = arith.addf %26, %25 : vector<32x8xf32>
    %28 = arith.divf %26, %27 : vector<32x8xf32>
    %29 = tpu.transpose %19, [0, 2, 1] : vector<4x8x8xf32> -> vector<4x8x8xf32>
    %30 = arith.truncf %29 : vector<4x8x8xf32> to vector<4x8x8xbf16>
    %c0_12 = arith.constant 0 : index
    %c0_13 = arith.constant 0 : index
    %c0_14 = arith.constant 0 : index
    %31 = vector.load %arg14[%c0_12, %c0_13, %c0_14] : memref<4x8x8xbf16, #tpu.memory_space<vmem>>, vector<4x8x8xbf16>
    %c0_15 = arith.constant 0 : index
    %c0_16 = arith.constant 0 : index
    %c0_17 = arith.constant 0 : index
    %32 = vector.load %arg15[%c0_15, %c0_16, %c0_17] : memref<4x8x8xbf16, #tpu.memory_space<vmem>>, vector<4x8x8xbf16>
    %cst_18 = arith.constant dense<0.000000e+00> : vector<4x8x8xf32>
    %33 = tpu.matmul %30, %31, %cst_18 {dimension_numbers = #tpu.dot_dimension_numbers<[2], [1], [1], [2], [0, 0, 0, 1, 1, 2], [0], [0]>} : vector<4x8x8xbf16>, vector<4x8x8xbf16>, vector<4x8x8xf32> -> vector<4x8x8xf32>
    %cst_19 = arith.constant dense<0xFF800000> : vector<4x8xf32>
    %34 = vector.multi_reduction <maximumf>, %33, %cst_19 [2] : vector<4x8x8xf32> to vector<4x8xf32>
    %35 = vector.shape_cast %34 : vector<4x8xf32> to vector<4x8x1xf32>
    %36 = vector.broadcast %35 : vector<4x8x1xf32> to vector<4x8x8xf32>
    %37 = arith.subf %33, %36 : vector<4x8x8xf32>
    %38 = math.exp %37 : vector<4x8x8xf32>
    %39 = arith.truncf %38 : vector<4x8x8xf32> to vector<4x8x8xbf16>
    %cst_20 = arith.constant dense<0.000000e+00> : vector<4x8x8xf32>
    %40 = tpu.matmul %32, %39, %cst_20 {dimension_numbers = #tpu.dot_dimension_numbers<[2], [2], [1], [1], [0, 0, 0, 1, 1, 1], [0], [0]>} : vector<4x8x8xbf16>, vector<4x8x8xbf16>, vector<4x8x8xf32> -> vector<4x8x8xf32>
    %cst_21 = arith.constant dense<0.000000e+00> : vector<4x8xf32>
    %41 = vector.multi_reduction <add>, %38, %cst_21 [2] : vector<4x8x8xf32> to vector<4x8xf32>
    %42 = tpu.reciprocal %41 {approx = true} : vector<4x8xf32> -> vector<4x8xf32>
    %43 = vector.shape_cast %42 : vector<4x8xf32> to vector<4x1x8xf32>
    %44 = vector.broadcast %43 : vector<4x1x8xf32> to vector<4x8x8xf32>
    %45 = arith.mulf %40, %44 : vector<4x8x8xf32>
    %46 = vector.shape_cast %45 : vector<4x8x8xf32> to vector<32x8xf32>
    %47 = arith.mulf %46, %28 : vector<32x8xf32>
    %c0_22 = arith.constant 0 : index
    %c0_23 = arith.constant 0 : index
    %48 = vector.load %arg7[%c0_22, %c0_23] : memref<32x32xbf16, #tpu.memory_space<vmem>>, vector<32x32xbf16>
    %49 = arith.truncf %47 : vector<32x8xf32> to vector<32x8xbf16>
    %cst_24 = arith.constant dense<0.000000e+00> : vector<32x8xf32>
    %50 = tpu.matmul %48, %49, %cst_24 {dimension_numbers = #tpu.dot_dimension_numbers<[1], [0], [0], [1], [0, 0, 1, 1], [], []>} : vector<32x32xbf16>, vector<32x8xbf16>, vector<32x8xf32> -> vector<32x8xf32>
    %c0_25 = arith.constant 0 : index
    %c0_26 = arith.constant 0 : index
    %51 = vector.load %arg8[%c0_25, %c0_26] : memref<32x1xf32, #tpu.memory_space<vmem>>, vector<32x1xf32>
    %52 = vector.broadcast %51 : vector<32x1xf32> to vector<32x8xf32>
    %53 = arith.addf %50, %52 : vector<32x8xf32>
    %c0_27 = arith.constant 0 : index
    %c0_28 = arith.constant 0 : index
    %c0_29 = arith.constant 0 : index
    %54 = vector.load %arg13[%c0_27, %c0_28, %c0_29] : memref<1x32x8xf32, #tpu.memory_space<vmem>>, vector<1x32x8xf32>
    %55 = vector.shape_cast %54 : vector<1x32x8xf32> to vector<32x8xf32>
    %56 = vector.shape_cast %53 : vector<32x8xf32> to vector<1x32x8xf32>
    tpu.vector_store %arg13[%c0_27, %c0_28, %c0_29], %56 {strides = array<i32>} : memref<1x32x8xf32, #tpu.memory_space<vmem>>, vector<1x32x8xf32>,
    return
  }
  func.func @transform_0(%arg0: i32, %arg1: i32) -> (i32, i32, i32) {
    %c0_i32 = arith.constant 0 : i32
    %c0_i32_0 = arith.constant 0 : i32
    %c0_i32_1 = arith.constant 0 : i32
    return %arg0, %c0_i32, %c0_i32_0 : i32, i32, i32
  }
  func.func @transform_1(%arg0: i32, %arg1: i32) -> (i32, i32, i32) {
    %c0_i32 = arith.constant 0 : i32
    %c0_i32_0 = arith.constant 0 : i32
    return %arg0, %c0_i32, %arg1 : i32, i32, i32
  }
  func.func @transform_2(%arg0: i32, %arg1: i32) -> (i32, i32) {
    %c0_i32 = arith.constant 0 : i32
    %c0_i32_0 = arith.constant 0 : i32
    %c0_i32_1 = arith.constant 0 : i32
    return %c0_i32, %c0_i32_0 : i32, i32
  }
  func.func @transform_3(%arg0: i32, %arg1: i32) -> (i32, i32) {
    %c0_i32 = arith.constant 0 : i32
    %c0_i32_0 = arith.constant 0 : i32
    %c0_i32_1 = arith.constant 0 : i32
    return %c0_i32, %c0_i32_0 : i32, i32
  }
  func.func @transform_4(%arg0: i32, %arg1: i32) -> (i32, i32) {
    %c0_i32 = arith.constant 0 : i32
    %c0_i32_0 = arith.constant 0 : i32
    %c0_i32_1 = arith.constant 0 : i32
    return %c0_i32, %c0_i32_0 : i32, i32
  }
  func.func @transform_5(%arg0: i32, %arg1: i32) -> (i32, i32) {
    %c0_i32 = arith.constant 0 : i32
    %c0_i32_0 = arith.constant 0 : i32
    %c0_i32_1 = arith.constant 0 : i32
    return %c0_i32, %c0_i32_0 : i32, i32
  }
  func.func @transform_6(%arg0: i32, %arg1: i32) -> (i32, i32) {
    %c0_i32 = arith.constant 0 : i32
    %c0_i32_0 = arith.constant 0 : i32
    %c0_i32_1 = arith.constant 0 : i32
    return %c0_i32, %c0_i32_0 : i32, i32
  }
  func.func @transform_7(%arg0: i32, %arg1: i32) -> (i32, i32) {
    %c0_i32 = arith.constant 0 : i32
    %c0_i32_0 = arith.constant 0 : i32
    %c0_i32_1 = arith.constant 0 : i32
    return %c0_i32, %c0_i32_0 : i32, i32
  }
  func.func @transform_8(%arg0: i32, %arg1: i32) -> (i32, i32) {
    %c0_i32 = arith.constant 0 : i32
    %c0_i32_0 = arith.constant 0 : i32
    %c0_i32_1 = arith.constant 0 : i32
    return %c0_i32, %c0_i32_0 : i32, i32
  }
  func.func @transform_9(%arg0: i32, %arg1: i32) -> (i32, i32) {
    %c0_i32 = arith.constant 0 : i32
    %c0_i32_0 = arith.constant 0 : i32
    return %c0_i32, %arg1 : i32, i32
  }
  func.func @transform_10(%arg0: i32, %arg1: i32) -> (i32, i32) {
    %c0_i32 = arith.constant 0 : i32
    %c0_i32_0 = arith.constant 0 : i32
    return %c0_i32, %arg1 : i32, i32
  }
  func.func @transform_11(%arg0: i32, %arg1: i32) -> (i32, i32, i32) {
    %c0_i32 = arith.constant 0 : i32
    %c0_i32_0 = arith.constant 0 : i32
    return %arg0, %c0_i32, %arg1 : i32, i32, i32
  }
}

module attributes {stable_mosaic.version = 11 : i64} {
  func.func @_mha_kernel(%arg0: i32, %arg1: i32, %arg2: memref<1x32x8xbf16, #tpu.memory_space<vmem>>, %arg3: memref<1x32x8xbf16, #tpu.memory_space<vmem>>, %arg4: memref<96x32xbf16, #tpu.memory_space<vmem>>, %arg5: memref<96x32xbf16, #tpu.memory_space<vmem>>, %arg6: memref<32x1xf32, #tpu.memory_space<vmem>>, %arg7: memref<32x32xbf16, #tpu.memory_space<vmem>>, %arg8: memref<32x1xf32, #tpu.memory_space<vmem>>, %arg9: memref<8x8xf32, #tpu.memory_space<vmem>>, %arg10: memref<8x8xf32, #tpu.memory_space<vmem>>, %arg11: memref<8x8xf32, #tpu.memory_space<vmem>>, %arg12: memref<8x8xf32, #tpu.memory_space<vmem>>, %arg13: memref<1x32x8xf32, #tpu.memory_space<vmem>>, %arg14: memref<4x8x8xbf16, #tpu.memory_space<vmem>>, %arg15: memref<4x8x8xbf16, #tpu.memory_space<vmem>>) attributes {dimension_semantics = [#tpu.dimension_semantics<parallel>, #tpu.dimension_semantics<arbitrary>], iteration_bounds = array<i64: 2, 1>, scalar_prefetch = 0 : i64, scratch_operands = 2 : i64, tpu.core_type = #tpu.core_type<tc>, window_params = [{transform_indices = @transform_0, window_bounds = array<i64: 1, 32, 8>}, {transform_indices = @transform_1, window_bounds = array<i64: 1, 32, 8>}, {pipeline_mode = #tpu.pipeline_mode<synchronous>, transform_indices = @transform_2, window_bounds = array<i64: 96, 32>}, {pipeline_mode = #tpu.pipeline_mode<synchronous>, transform_indices = @transform_3, window_bounds = array<i64: 96, 32>}, {pipeline_mode = #tpu.pipeline_mode<synchronous>, transform_indices = @transform_4, window_bounds = array<i64: 32, 1>}, {pipeline_mode = #tpu.pipeline_mode<synchronous>, transform_indices = @transform_5, window_bounds = array<i64: 32, 32>}, {pipeline_mode = #tpu.pipeline_mode<synchronous>, transform_indices = @transform_6, window_bounds = array<i64: 32, 1>}, {pipeline_mode = #tpu.pipeline_mode<synchronous>, transform_indices = @transform_7, window_bounds = array<i64: 8, 8>}, {pipeline_mode = #tpu.pipeline_mode<synchronous>, transform_indices = @transform_8, window_bounds = array<i64: 8, 8>}, {transform_indices = @transform_9, window_bounds = array<i64: 8, 8>}, {transform_indices = @transform_10, window_bounds = array<i64: 8, 8>}, {transform_indices = @transform_11, window_bounds = array<i64: 1, 32, 8>}]} {
    %c0_i32 = arith.constant 0 : i32
    %0 = arith.cmpi eq, %arg1, %c0_i32 : i32
    %1 = arith.extui %0 : i1 to i32
    %c0_i32_0 = arith.constant 0 : i32
    %2 = arith.cmpi ne, %1, %c0_i32_0 : i32
    scf.if %2 {
      %c0_30 = arith.constant 0 : index
      %c0_31 = arith.constant 0 : index
      %c0_32 = arith.constant 0 : index
      %57 = vector.load %arg2[%c0_30, %c0_31, %c0_32] : memref<1x32x8xbf16, #tpu.memory_space<vmem>>, vector<1x32x8xbf16>
      %58 = vector.shape_cast %57 : vector<1x32x8xbf16> to vector<32x8xbf16>
      %c0_33 = arith.constant 0 : index
      %c0_34 = arith.constant 0 : index
      %59 = vector.load %arg4[%c0_33, %c0_34] : memref<96x32xbf16, #tpu.memory_space<vmem>>, vector<96x32xbf16>
      %cst_35 = arith.constant dense<0.000000e+00> : vector<96x8xf32>
      %60 = tpu.matmul %59, %58, %cst_35 {dimension_numbers = #tpu.dot_dimension_numbers<[1], [0], [0], [1], [0, 0, 1, 1], [], []>} : vector<96x32xbf16>, vector<32x8xbf16>, vector<96x8xf32> -> vector<96x8xf32>
      %c0_36 = arith.constant 0 : index
      %c0_37 = arith.constant 0 : index
      %61 = vector.load %arg9[%c0_36, %c0_37] : memref<8x8xf32, #tpu.memory_space<vmem>>, vector<8x8xf32>
      %62 = vector.shape_cast %61 : vector<8x8xf32> to vector<1x8x8xf32>
      %c0_38 = arith.constant 0 : index
      %c0_39 = arith.constant 0 : index
      %63 = vector.load %arg10[%c0_38, %c0_39] : memref<8x8xf32, #tpu.memory_space<vmem>>, vector<8x8xf32>
      %64 = vector.shape_cast %63 : vector<8x8xf32> to vector<1x8x8xf32>
      %65 = vector.extract_strided_slice %60 {offsets = [0, 0], sizes = [32, 8], strides = [1, 1]} : vector<96x8xf32> to vector<32x8xf32>
      %66 = vector.shape_cast %65 : vector<32x8xf32> to vector<4x8x8xf32>
      %67 = vector.extract_strided_slice %60 {offsets = [32, 0], sizes = [32, 8], strides = [1, 1]} : vector<96x8xf32> to vector<32x8xf32>
      %68 = vector.shape_cast %67 : vector<32x8xf32> to vector<4x8x8xf32>
      %69 = vector.broadcast %62 : vector<1x8x8xf32> to vector<4x8x8xf32>
      %70 = arith.mulf %66, %69 : vector<4x8x8xf32>
      %71 = vector.broadcast %64 : vector<1x8x8xf32> to vector<4x8x8xf32>
      %72 = arith.mulf %68, %71 : vector<4x8x8xf32>
      %73 = arith.addf %70, %72 : vector<4x8x8xf32>
      %74 = arith.truncf %73 : vector<4x8x8xf32> to vector<4x8x8xbf16>
      %c0_40 = arith.constant 0 : index
      %c0_41 = arith.constant 0 : index
      %c0_42 = arith.constant 0 : index
      %75 = vector.load %arg14[%c0_40, %c0_41, %c0_42] : memref<4x8x8xbf16, #tpu.memory_space<vmem>>, vector<4x8x8xbf16>
      tpu.vector_store %arg14[%c0_40, %c0_41, %c0_42], %74 {strides = array<i32>} : memref<4x8x8xbf16, #tpu.memory_space<vmem>>, vector<4x8x8xbf16>,
      %76 = vector.extract_strided_slice %60 {offsets = [64, 0], sizes = [32, 8], strides = [1, 1]} : vector<96x8xf32> to vector<32x8xf32>
      %77 = vector.shape_cast %76 : vector<32x8xf32> to vector<4x8x8xf32>
      %78 = arith.truncf %77 : vector<4x8x8xf32> to vector<4x8x8xbf16>
      %c0_43 = arith.constant 0 : index
      %c0_44 = arith.constant 0 : index
      %c0_45 = arith.constant 0 : index
      %79 = vector.load %arg15[%c0_43, %c0_44, %c0_45] : memref<4x8x8xbf16, #tpu.memory_space<vmem>>, vector<4x8x8xbf16>
      tpu.vector_store %arg15[%c0_43, %c0_44, %c0_45], %78 {strides = array<i32>} : memref<4x8x8xbf16, #tpu.memory_space<vmem>>, vector<4x8x8xbf16>,
    } else {
    }
    %c0 = arith.constant 0 : index
    %c0_1 = arith.constant 0 : index
    %c0_2 = arith.constant 0 : index
    %3 = vector.load %arg3[%c0, %c0_1, %c0_2] : memref<1x32x8xbf16, #tpu.memory_space<vmem>>, vector<1x32x8xbf16>
    %4 = vector.shape_cast %3 : vector<1x32x8xbf16> to vector<32x8xbf16>
    %c0_3 = arith.constant 0 : index
    %c0_4 = arith.constant 0 : index
    %5 = vector.load %arg5[%c0_3, %c0_4] : memref<96x32xbf16, #tpu.memory_space<vmem>>, vector<96x32xbf16>
    %cst = arith.constant dense<0.000000e+00> : vector<96x8xf32>
    %6 = tpu.matmul %5, %4, %cst {dimension_numbers = #tpu.dot_dimension_numbers<[1], [0], [0], [1], [0, 0, 1, 1], [], []>} : vector<96x32xbf16>, vector<32x8xbf16>, vector<96x8xf32> -> vector<96x8xf32>
    %c0_5 = arith.constant 0 : index
    %c0_6 = arith.constant 0 : index
    %7 = vector.load %arg11[%c0_5, %c0_6] : memref<8x8xf32, #tpu.memory_space<vmem>>, vector<8x8xf32>
    %8 = vector.shape_cast %7 : vector<8x8xf32> to vector<1x8x8xf32>
    %c0_7 = arith.constant 0 : index
    %c0_8 = arith.constant 0 : index
    %9 = vector.load %arg12[%c0_7, %c0_8] : memref<8x8xf32, #tpu.memory_space<vmem>>, vector<8x8xf32>
    %10 = vector.shape_cast %9 : vector<8x8xf32> to vector<1x8x8xf32>
    %11 = vector.extract_strided_slice %6 {offsets = [0, 0], sizes = [32, 8], strides = [1, 1]} : vector<96x8xf32> to vector<32x8xf32>
    %12 = vector.shape_cast %11 : vector<32x8xf32> to vector<4x8x8xf32>
    %13 = vector.extract_strided_slice %6 {offsets = [32, 0], sizes = [32, 8], strides = [1, 1]} : vector<96x8xf32> to vector<32x8xf32>
    %14 = vector.shape_cast %13 : vector<32x8xf32> to vector<4x8x8xf32>
    %15 = vector.broadcast %8 : vector<1x8x8xf32> to vector<4x8x8xf32>
    %16 = arith.mulf %12, %15 : vector<4x8x8xf32>
    %17 = vector.broadcast %10 : vector<1x8x8xf32> to vector<4x8x8xf32>
    %18 = arith.mulf %14, %17 : vector<4x8x8xf32>
    %19 = arith.addf %16, %18 : vector<4x8x8xf32>
    %20 = vector.extract_strided_slice %6 {offsets = [64, 0], sizes = [32, 8], strides = [1, 1]} : vector<96x8xf32> to vector<32x8xf32>
    %c0_9 = arith.constant 0 : index
    %c0_10 = arith.constant 0 : index
    %21 = vector.load %arg6[%c0_9, %c0_10] : memref<32x1xf32, #tpu.memory_space<vmem>>, vector<32x1xf32>
    %22 = vector.broadcast %21 : vector<32x1xf32> to vector<32x8xf32>
    %23 = arith.addf %20, %22 : vector<32x8xf32>
    %24 = arith.negf %23 : vector<32x8xf32>
    %25 = math.exp %24 : vector<32x8xf32>
    %cst_11 = arith.constant 1.000000e+00 : f32
    %26 = vector.broadcast %cst_11 : f32 to vector<32x8xf32>
    %27 = arith.addf %26, %25 : vector<32x8xf32>
    %28 = arith.divf %26, %27 : vector<32x8xf32>
    %29 = tpu.transpose %19, [0, 2, 1] : vector<4x8x8xf32> -> vector<4x8x8xf32>
    %30 = arith.truncf %29 : vector<4x8x8xf32> to vector<4x8x8xbf16>
    %c0_12 = arith.constant 0 : index
    %c0_13 = arith.constant 0 : index
    %c0_14 = arith.constant 0 : index
    %31 = vector.load %arg14[%c0_12, %c0_13, %c0_14] : memref<4x8x8xbf16, #tpu.memory_space<vmem>>, vector<4x8x8xbf16>
    %c0_15 = arith.constant 0 : index
    %c0_16 = arith.constant 0 : index
    %c0_17 = arith.constant 0 : index
    %32 = vector.load %arg15[%c0_15, %c0_16, %c0_17] : memref<4x8x8xbf16, #tpu.memory_space<vmem>>, vector<4x8x8xbf16>
    %cst_18 = arith.constant dense<0.000000e+00> : vector<4x8x8xf32>
    %33 = tpu.matmul %30, %31, %cst_18 {dimension_numbers = #tpu.dot_dimension_numbers<[2], [1], [1], [2], [0, 0, 0, 1, 1, 2], [0], [0]>} : vector<4x8x8xbf16>, vector<4x8x8xbf16>, vector<4x8x8xf32> -> vector<4x8x8xf32>
    %cst_19 = arith.constant dense<0xFF800000> : vector<4x8xf32>
    %34 = vector.multi_reduction <maximumf>, %33, %cst_19 [2] : vector<4x8x8xf32> to vector<4x8xf32>
    %35 = vector.shape_cast %34 : vector<4x8xf32> to vector<4x8x1xf32>
    %36 = vector.broadcast %35 : vector<4x8x1xf32> to vector<4x8x8xf32>
    %37 = arith.subf %33, %36 : vector<4x8x8xf32>
    %38 = math.exp %37 : vector<4x8x8xf32>
    %39 = arith.truncf %38 : vector<4x8x8xf32> to vector<4x8x8xbf16>
    %cst_20 = arith.constant dense<0.000000e+00> : vector<4x8x8xf32>
    %40 = tpu.matmul %32, %39, %cst_20 {dimension_numbers = #tpu.dot_dimension_numbers<[2], [2], [1], [1], [0, 0, 0, 1, 1, 1], [0], [0]>} : vector<4x8x8xbf16>, vector<4x8x8xbf16>, vector<4x8x8xf32> -> vector<4x8x8xf32>
    %cst_21 = arith.constant dense<0.000000e+00> : vector<4x8xf32>
    %41 = vector.multi_reduction <add>, %38, %cst_21 [2] : vector<4x8x8xf32> to vector<4x8xf32>
    %42 = tpu.reciprocal %41 {approx = true} : vector<4x8xf32> -> vector<4x8xf32>
    %43 = vector.shape_cast %42 : vector<4x8xf32> to vector<4x1x8xf32>
    %44 = vector.broadcast %43 : vector<4x1x8xf32> to vector<4x8x8xf32>
    %45 = arith.mulf %40, %44 : vector<4x8x8xf32>
    %46 = vector.shape_cast %45 : vector<4x8x8xf32> to vector<32x8xf32>
    %47 = arith.mulf %46, %28 : vector<32x8xf32>
    %c0_22 = arith.constant 0 : index
    %c0_23 = arith.constant 0 : index
    %48 = vector.load %arg7[%c0_22, %c0_23] : memref<32x32xbf16, #tpu.memory_space<vmem>>, vector<32x32xbf16>
    %49 = arith.truncf %47 : vector<32x8xf32> to vector<32x8xbf16>
    %cst_24 = arith.constant dense<0.000000e+00> : vector<32x8xf32>
    %50 = tpu.matmul %48, %49, %cst_24 {dimension_numbers = #tpu.dot_dimension_numbers<[1], [0], [0], [1], [0, 0, 1, 1], [], []>} : vector<32x32xbf16>, vector<32x8xbf16>, vector<32x8xf32> -> vector<32x8xf32>
    %c0_25 = arith.constant 0 : index
    %c0_26 = arith.constant 0 : index
    %51 = vector.load %arg8[%c0_25, %c0_26] : memref<32x1xf32, #tpu.memory_space<vmem>>, vector<32x1xf32>
    %52 = vector.broadcast %51 : vector<32x1xf32> to vector<32x8xf32>
    %53 = arith.addf %50, %52 : vector<32x8xf32>
    %c0_27 = arith.constant 0 : index
    %c0_28 = arith.constant 0 : index
    %c0_29 = arith.constant 0 : index
    %54 = vector.load %arg13[%c0_27, %c0_28, %c0_29] : memref<1x32x8xf32, #tpu.memory_space<vmem>>, vector<1x32x8xf32>
    %55 = vector.shape_cast %54 : vector<1x32x8xf32> to vector<32x8xf32>
    %56 = vector.shape_cast %53 : vector<32x8xf32> to vector<1x32x8xf32>
    tpu.vector_store %arg13[%c0_27, %c0_28, %c0_29], %56 {strides = array<i32>} : memref<1x32x8xf32, #tpu.memory_space<vmem>>, vector<1x32x8xf32>,
    return
  }
  func.func @transform_0(%arg0: i32, %arg1: i32) -> (i32, i32, i32) {
    %c0_i32 = arith.constant 0 : i32
    %c0_i32_0 = arith.constant 0 : i32
    %c0_i32_1 = arith.constant 0 : i32
    return %arg0, %c0_i32, %c0_i32_0 : i32, i32, i32
  }
  func.func @transform_1(%arg0: i32, %arg1: i32) -> (i32, i32, i32) {
    %c0_i32 = arith.constant 0 : i32
    %c0_i32_0 = arith.constant 0 : i32
    return %arg0, %c0_i32, %arg1 : i32, i32, i32
  }
  func.func @transform_2(%arg0: i32, %arg1: i32) -> (i32, i32) {
    %c0_i32 = arith.constant 0 : i32
    %c0_i32_0 = arith.constant 0 : i32
    %c0_i32_1 = arith.constant 0 : i32
    return %c0_i32, %c0_i32_0 : i32, i32
  }
  func.func @transform_3(%arg0: i32, %arg1: i32) -> (i32, i32) {
    %c0_i32 = arith.constant 0 : i32
    %c0_i32_0 = arith.constant 0 : i32
    %c0_i32_1 = arith.constant 0 : i32
    return %c0_i32, %c0_i32_0 : i32, i32
  }
  func.func @transform_4(%arg0: i32, %arg1: i32) -> (i32, i32) {
    %c0_i32 = arith.constant 0 : i32
    %c0_i32_0 = arith.constant 0 : i32
    %c0_i32_1 = arith.constant 0 : i32
    return %c0_i32, %c0_i32_0 : i32, i32
  }
  func.func @transform_5(%arg0: i32, %arg1: i32) -> (i32, i32) {
    %c0_i32 = arith.constant 0 : i32
    %c0_i32_0 = arith.constant 0 : i32
    %c0_i32_1 = arith.constant 0 : i32
    return %c0_i32, %c0_i32_0 : i32, i32
  }
  func.func @transform_6(%arg0: i32, %arg1: i32) -> (i32, i32) {
    %c0_i32 = arith.constant 0 : i32
    %c0_i32_0 = arith.constant 0 : i32
    %c0_i32_1 = arith.constant 0 : i32
    return %c0_i32, %c0_i32_0 : i32, i32
  }
  func.func @transform_7(%arg0: i32, %arg1: i32) -> (i32, i32) {
    %c0_i32 = arith.constant 0 : i32
    %c0_i32_0 = arith.constant 0 : i32
    %c0_i32_1 = arith.constant 0 : i32
    return %c0_i32, %c0_i32_0 : i32, i32
  }
  func.func @transform_8(%arg0: i32, %arg1: i32) -> (i32, i32) {
    %c0_i32 = arith.constant 0 : i32
    %c0_i32_0 = arith.constant 0 : i32
    %c0_i32_1 = arith.constant 0 : i32
    return %c0_i32, %c0_i32_0 : i32, i32
  }
  func.func @transform_9(%arg0: i32, %arg1: i32) -> (i32, i32) {
    %c0_i32 = arith.constant 0 : i32
    %c0_i32_0 = arith.constant 0 : i32
    return %c0_i32, %arg1 : i32, i32
  }
  func.func @transform_10(%arg0: i32, %arg1: i32) -> (i32, i32) {
    %c0_i32 = arith.constant 0 : i32
    %c0_i32_0 = arith.constant 0 : i32
    return %c0_i32, %arg1 : i32, i32
  }
  func.func @transform_11(%arg0: i32, %arg1: i32) -> (i32, i32, i32) {
    %c0_i32 = arith.constant 0 : i32
    %c0_i32_0 = arith.constant 0 : i32
    return %arg0, %c0_i32, %arg1 : i32, i32, i32
  }
}

</mosaic_0001>

<bundles_post_ra>
// kernel: tpu_custom_call.1
= control target key start
LH: loop header
LB: loop body
LE: loop exit
PB: predicated region body
PF: predicated region fallthrough
CT: control target
= control target key end

     0   :  { %s2099_s17 = smov 0   ;;  %s2101_s18 = smov 0   ;;  %s2303_s0 = inlined_call_operand.vmem [shape: bf16[2,32,8], index: 0, kind: input, shape index: {}]   ;;  %s2304_s1 = inlined_call_operand.vmem [shape: bf16[2,32,8], index: 1, kind: input, shape index: {}]   ;;  %s2305_s2 = inlined_call_operand.vmem [shape: bf16[96,32], index: 2, kind: input, shape index: {}]   ;;  %s2306_s3 = inlined_call_operand.vmem [shape: bf16[96,32], index: 3, kind: input, shape index: {}]   ;;  %s2307_s4 = inlined_call_operand.vmem [shape: f32[32,1], index: 4, kind: input, shape index: {}]   ;;  %s2308_s5 = inlined_call_operand.vmem [shape: bf16[32,32], index: 5, kind: input, shape index: {}]   ;;  %s2309_s6 = inlined_call_operand.vmem [shape: f32[32,1], index: 6, kind: input, shape index: {}]   ;;  %s2310_s7 = inlined_call_operand.vmem [shape: f32[8,8], index: 7, kind: input, shape index: {}]   ;;  %s2311_s8 = inlined_call_operand.vmem [shape: f32[8,8], index: 8, kind: input, shape index: {}]   ;;  %s2312_s9 = inlined_call_operand.vmem [shape: f32[8,8], index: 9, kind: input, shape index: {}]   ;;  %s2313_s10 = inlined_call_operand.vmem [shape: f32[8,8], index: 10, kind: input, shape index: {}]   ;;  %s2314_s11 = inlined_call_operand.vmem [shape: f32[2,32,8], index: 11, kind: output, shape index: {}]  }
   0x1   :  { %s2103_s19 = smov 0  }
   0x2 LB: > { %s33_s20 = sadd.s32 1, %s2030_s18  ;;  %p1739_p0 = scmp.ge.s32.totalorder %s2034_s19, 1  ;;  %s2034_s19 = sphi %s2103_s19, %s21_s19   ;;  %s2030_s18 = sphi %s2101_s18, %s2316_s18   ;;  %s2026_s17 = sphi %s2099_s17, %s2315_s17  }
   0x3   : > { %p35_p1 = scmp.ge.s32.totalorder %s33_s20, 2  ;;  %p384_p2 = scmp.lt.s32.totalorder %s2034_s19, 3 }
   0x5   : > { %s2318_s20 = smov (%p35_p1, %s33_s20), 0  ;;  %p385_p3 = pnand %p1739_p0, %p384_p2 }
   0x6   : > { %p443_p4 = scmp.lt.s32.totalorder (!%p385_p3), %s2026_s17, 1 }
   0x7   : > { %388 = sbr.rel (%p385_p3) target bundleno = 1147 (0x47b), region = 64 }
   0xc   : > { %vm535_vm0 = vcmask 261120   ;;  %v1964_v0 = vld [vmem:[%s2306_s3] sm:$0xff]   ;;  %s2320_s17 = smov (!%p443_p4, %s2026_s17), 1  ;;  %v1965_v6 = vld [vmem:[%s2306_s3 + $0x8] sm:$0xff]   ;;  %v1966_v7 = vld [vmem:[%s2306_s3 + $0x10] sm:$0xff]   ;;  %v2036_v12 = vmov 0.0  }
   0xd   : > { %1851 = vmatprep.mubr.msk.bf16.mxu1 %vm535_vm0, %v1964_v0  ;;  %s1792_s23 = sshll.u32 %s2320_s17, 4  ;;  %v1970_v1 = vld [vmem:[%s2305_s2] sm:$0xff]   ;;  %v1971_v8 = vld [vmem:[%s2305_s2 + $0x8] sm:$0xff]   ;;  %v1972_v9 = vld [vmem:[%s2305_s2 + $0x10] sm:$0xff]   ;;  %vm653_vm1 = vcmask 60416   ;;  %vm2037_vm2 = vmmov 0  }
   0xe   : > { %s455_s26 = scalar_lea.vmem %s2304_s1, %s1792_s23  ;;  %s447_s29 = scalar_lea.vmem %s2303_s0, %s1792_s23  ;;  %1835 = vmatprep.mubr.msk.bf16.mxu0 %vm535_vm0, %v1970_v1  ;;  %v1967_v10 = vld [vmem:[%s2306_s3 + $0x18] sm:$0xff]   ;;  %v1974_v13 = vld [vmem:[%s2305_s2 + $0x20] sm:$0xff]   ;;  %v1975_v14 = vld [vmem:[%s2305_s2 + $0x28] sm:$0xff]   ;;  %vm1034_vm3 = vcmask 1043456   ;;  %vm1030_vm4 = vcmask 64512  }
   0xf   : > { %v1962_v2 = vld [vmem:[%s455_s26 + $0x8] sm:$0xff]   ;;  %v1963_v3 = vld [vmem:[%s455_s26] sm:$0xff]   ;;  %v1973_v11 = vld [vmem:[%s2305_s2 + $0x18] sm:$0xff]   ;;  %s1794_s16 = sshll.u32 %s2320_s17, 5 }
  0x10   : > { %1847 = vmatprep.subr.bf16.mxu1 %v1962_v2  ;;  %v1968_v4 = vld [vmem:[%s447_s29 + $0x8] sm:$0xff]   ;;  %v1969_v5 = vld [vmem:[%s447_s29] sm:$0xff]   ;;  %s471_s23 = scalar_lea.vmem %s2314_s11, %s1794_s16 }
  0x11   : > { %1848 = vmatpush3.bf16.msra.mxu1 %v1962_v2  ;;  %1831 = vmatprep.subr.bf16.mxu0 %v1968_v4  ;;  %v1976_v15 = vld [vmem:[%s2306_s3 + $0x20] sm:$0xff]   ;;  %v1977_v16 = vld [vmem:[%s2306_s3 + $0x28] sm:$0xff]  }
  0x12   : > { %1849 = vmatprep.subr.bf16.mxu1 %v1963_v3  ;;  %1832 = vmatpush3.bf16.msra.mxu0 %v1968_v4  ;;  %v635_v23 = vld [vmem:[%s2310_s7] sm:$0xff] }
  0x13   : > { %1833 = vmatprep.subr.bf16.mxu0 %v1969_v5  ;;  %v636_v27 = vld [vmem:[%s2311_s8] sm:$0xff] }
  0x14   : > { %v825_v33 = vld [vmem:[%s2313_s10] sm:$0xff] }
  0x15   : > { %1850 = vmatpush3.bf16.msra.mxu1 %v1963_v3  ;;  %v824_v36 = vld [vmem:[%s2312_s9] sm:$0xff] }
  0x16   : > { %1834 = vmatpush3.bf16.msra.mxu0 %v1969_v5  ;;  %1869 = vmatprep.subr.bf16.mxu1 %v2036_v12 }
  0x17   : > { %1863 = vmatprep.subr.bf16.mxu0 %v2036_v12 }
  0x18   : > { %1852 = vmatmul.mubr.msk.bf16.vlgmr.msra.gmra.mxu1 %vm535_vm0, %v1965_v6 }
  0x19   : > { %1855 = vmatprep.mubr.msk.bf16.mxu1 %vm535_vm0, %v1966_v7  ;;  %1836 = vmatmul.mubr.msk.bf16.vlgmr.msra.gmra.mxu0 %vm535_vm0, %v1971_v8 }
  0x1a   : > { %1839 = vmatprep.mubr.msk.bf16.mxu0 %vm535_vm0, %v1972_v9 }
  0x20   : > { %1856 = vmatmul.mubr.msk.bf16.gmra.mxu1 %vm535_vm0, %v1967_v10 }
  0x21   : > { %1840 = vmatmul.mubr.msk.bf16.gmra.mxu0 %vm535_vm0, %v1973_v11  ;;  %1859 = vmatprep.mubr.msk.bf16.mxu1 %vm535_vm0, %v1976_v15 }
  0x22   : > { %1843 = vmatprep.mubr.msk.bf16.mxu0 %vm535_vm0, %v1974_v13 }
  0x28   : > { %1860 = vmatmul.mubr.msk.bf16.gmra.mxu1 %vm535_vm0, %v1977_v16 }
  0x29   : > { %1844 = vmatmul.mubr.msk.bf16.gmra.mxu0 %vm535_vm0, %v1975_v14  ;;  %1871 = vmatprep.mubr.msk.bf16.mxu1 %vm2037_vm2, %v2036_v12 }
  0x2a   : > { %1865 = vmatprep.mubr.msk.bf16.mxu0 %vm2037_vm2, %v2036_v12 }
  0xd8   : > { %v1853_v17 = vpop.f32.mrf.mxu1 }
  0xd9   : > { %v1837_v19 = vpop.f32.mrf.mxu0  ;;  %v828_v59 = vmul.f32 %v1853_v17, %v824_v36 }
  0xda   : > { %v777_v18 = vpop.f32.mrf.mxu1  ;;  %v639_v28 = vmul.f32 %v1837_v19, %v635_v23 }
  0xdb   : > { %v588_v21 = vpop.f32.mrf.mxu0  ;;  %v826_v40 = vmul.f32 %v824_v36, %v777_v18 }
  0xdc   : > { %v1854_v20 = vpop.f32.mrf.mxu1  ;;  %v637_v31 = vmul.f32 %v635_v23, %v588_v21 }
  0xdd   : > { %v1838_v24 = vpop.f32.mrf.mxu0  ;;  %v829_v50 = vmul.f32 %v1854_v20, %v824_v36 }
  0xde   : > { %v780_v22 = vpop.f32.mrf.mxu1  ;;  %v640_v43 = vmul.f32 %v1838_v24, %v635_v23 }
  0xdf   : > { %v591_v26 = vpop.f32.mrf.mxu0  ;;  %v827_v41 = vmul.f32 %v824_v36, %v780_v22 }
  0xe0   : > { %v1857_v25 = vpop.f32.mrf.mxu1  ;;  %v638_v44 = vmul.f32 %v635_v23, %v591_v26 }
  0xe1   : > { %v1841_v30 = vpop.f32.mrf.mxu0  ;;  %v832_v51 = vmul.f32 %v1857_v25, %v825_v33 }
  0xe2   : > { %v793_v29 = vpop.f32.mrf.mxu1  ;;  %v643_v32 = vmul.f32 %v1841_v30, %v636_v27  ;;  %v2038_v30 = vmov 0  }
  0xe3   : > { %v604_v35 = vpop.f32.mrf.mxu0  ;;  %v830_v37 = vmul.f32 %v825_v33, %v793_v29  ;;  %v836_v0 = vadd.f32 %v832_v51, %v828_v59  ;;  %1960 = vset.pattern.permute.xlu1 %v2038_v30 }
  0xe4   : > { %v1858_v34 = vpop.f32.mrf.mxu1  ;;  %v647_v38 = vadd.f32 %v643_v32, %v639_v28  ;;  %v641_v39 = vmul.f32 %v636_v27, %v604_v35 }
  0xe5   : > { %v1842_v45 = vpop.f32.mrf.mxu0  ;;  %v833_v46 = vmul.f32 %v1858_v34, %v825_v33  ;;  %v834_v54 = vadd.f32 %v830_v37, %v826_v40 }
  0xe6   : > { %v796_v42 = vpop.f32.mrf.mxu1  ;;  %v651_v48 = vpack.c.bf16 %v647_v38, %v647_v38  ;;  %v645_v49 = vadd.f32 %v641_v39, %v637_v31  ;;  %v644_v52 = vmul.f32 %v1842_v45, %v636_v27 }
  0xe7   : > { %v831_v47 = vmul.f32 %v825_v33, %v796_v42  ;;  %v607_v53 = vpop.f32.mrf.mxu0  ;;  %v837_v60 = vadd.f32 %v833_v46, %v829_v50 }
  0xe8   : > { %656 = vst.msk [vmem:[#allocation2 + $0x8] sm:$0xf] %vm653_vm1, %v651_v48  ;;  %v649_v56 = vpack.c.bf16 %v645_v49, %v645_v49  ;;  %v642_v57 = vmul.f32 %v636_v27, %v607_v53  ;;  %v648_v58 = vadd.f32 %v644_v52, %v640_v43  ;;  %v2220_v31 = vpop.f32.mrf.mxu1 }
  0xe9   : > { %v835_v55 = vadd.f32 %v831_v47, %v827_v41  ;;  %v1953_v2 = vpack.i.bf16 %v837_v60, %v836_v0  ;;  %v1845_v7 = vpop.f32.mrf.mxu0 }
  0xea   : > { %654 = vst.msk [vmem:[#allocation2] sm:$0xf] %vm653_vm1, %v649_v56  ;;  %v646_v62 = vadd.f32 %v642_v57, %v638_v44  ;;  %v652_v63 = vpack.c.bf16 %v648_v58, %v648_v58  ;;  %v660_v8 = vpack.c.bf16 %v1845_v7, %v1845_v7  ;;  %v2222_v32 = vpop.f32.mrf.mxu1  ;;  %v841_v56 = vld [vmem:[%s2307_s4 + $0x18] sm:$0xff]  ;;  %v838_v57 = vld [vmem:[%s2307_s4] sm:$0xff]  ;;  %v839_v58 = vld [vmem:[%s2307_s4 + $0x8] sm:$0xff] }
  0xeb   : > { %v1946_v61 = vpack.i.bf16 %v835_v55, %v834_v54  ;;  %v620_v9 = vpop.f32.mrf.mxu0  ;;  %v840_v55 = vld [vmem:[%s2307_s4 + $0x10] sm:$0xff] }
  0xec   : > { %v650_v1 = vpack.c.bf16 %v646_v62, %v646_v62  ;;  %657 = vst.msk [vmem:[#allocation2 + $0xc] sm:$0xf] %vm653_vm1, %v652_v63  ;;  %664 = vst.msk [vmem:[#allocation3 + $0x8] sm:$0xf] %vm653_vm1, %v660_v8  ;;  %v658_v10 = vpack.c.bf16 %v620_v9, %v620_v9  ;;  %v2224_v33 = vpop.f32.mrf.mxu1 }
  0xed   : > { %1947 = vxpose.xlu0.b32.start.end [1/1] (short) (narrow) %v1946_v61, 8  ;;  %v1846_v11 = vpop.f32.mrf.mxu0 }
  0xee   : > { %655 = vst.msk [vmem:[#allocation2 + $0x4] sm:$0xf] %vm653_vm1, %v650_v1  ;;  %662 = vst.msk [vmem:[#allocation3] sm:$0xf] %vm653_vm1, %v658_v10  ;;  %v661_v13 = vpack.c.bf16 %v1846_v11, %v1846_v11  ;;  %v2226_v34 = vpop.f32.mrf.mxu1 }
  0xef   : > { %v623_v14 = vpop.f32.mrf.mxu0  ;;  %v1024_v19 = vld [vmem:[#allocation2 + $0x8] sm:$0xf] }
  0xf0   : > { %665 = vst.msk [vmem:[#allocation3 + $0xc] sm:$0xf] %vm653_vm1, %v661_v13  ;;  %v659_v15 = vpack.c.bf16 %v623_v14, %v623_v14  ;;  %v1128_v23 = vsel %vm1034_vm3, %v1024_v19, 0 }
  0xf1   : > { %1954 = vxpose.xlu0.b32.start.end [1/1] (short) (narrow) %v1953_v2, 8  ;;  %v1022_v3 = vld [vmem:[#allocation2] sm:$0xf] }
  0xf2   : > { %v1036_v4 = vsel %vm1034_vm3, %v1022_v3, 0  ;;  %663 = vst.msk [vmem:[#allocation3 + $0x4] sm:$0xf] %vm653_vm1, %v659_v15 }
  0xf3   : > { %1864 = vmatpush3.bf16.msra.mxu0 %v1036_v4  ;;  %v1025_v20 = vld [vmem:[#allocation2 + $0xc] sm:$0xf] }
  0xf4   : > { %1875 = vmatprep.subr.bf16.mxu0 %v2036_v12  ;;  %v1174_v24 = vsel %vm1034_vm3, %v1025_v20, 0 }
  0xf5   : > { %v1023_v5 = vld [vmem:[#allocation2 + $0x4] sm:$0xf]  ;;  %v1026_v19 = vld [vmem:[#allocation3] sm:$0xf] }
  0xf6   : > { %v1082_v6 = vsel %vm1034_vm3, %v1023_v5, 0 }
  0xf7   : > { %1870 = vmatpush3.bf16.msra.mxu1 %v1082_v6 }
  0xf8   : > { %1881 = vmatprep.subr.bf16.mxu1 %v2036_v12 }
 0x11a   : > { %1961 = vset.pattern.permute.xlu0 %v2038_v30  ;;  %v1978_v30 = vld [vmem:[%s2308_s5] sm:$0xff]  }
 0x169   : > { %v1948_v16 = vpop.trf.xlu0 }
 0x16a   : > { %v1952_v17 = vunpack.i.h.bf16 %v1948_v16  ;;  %v1949_v18 = vunpack.i.l.bf16 %v1948_v16 }
 0x16c   : > { %v1019_v21 = vpack.c.bf16 %v1952_v17, %v1952_v17  ;;  %v1018_v22 = vpack.c.bf16 %v1949_v18, %v1949_v18 }
 0x16d   : > { %v1955_v25 = vpop.trf.xlu0 }
 0x16e   : > { %1866 = vmatmul.mubr.msk.bf16.vlgmr.msra.gmra.mxu0 %vm1030_vm4, %v1018_v22  ;;  %1872 = vmatmul.mubr.msk.bf16.vlgmr.msra.gmra.mxu1 %vm1030_vm4, %v1019_v21  ;;  %v1959_v26 = vunpack.i.h.bf16 %v1955_v25  ;;  %v1956_v27 = vunpack.i.l.bf16 %v1955_v25 }
 0x16f   : > { %1876 = vmatpush3.bf16.msra.mxu0 %v1128_v23  ;;  %1882 = vmatpush3.bf16.msra.mxu1 %v1174_v24  ;;  %v1027_v24 = vld [vmem:[#allocation3 + $0x4] sm:$0xf] }
 0x170   : > { %1877 = vmatprep.mubr.msk.bf16.mxu0 %vm2037_vm2, %v2036_v12  ;;  %1883 = vmatprep.mubr.msk.bf16.mxu1 %vm2037_vm2, %v2036_v12  ;;  %v1021_v28 = vpack.c.bf16 %v1959_v26, %v1959_v26  ;;  %v1020_v29 = vpack.c.bf16 %v1956_v27, %v1956_v27  ;;  %v1028_v26 = vld [vmem:[#allocation3 + $0x8] sm:$0xf]  ;;  %v1029_v27 = vld [vmem:[#allocation3 + $0xc] sm:$0xf] }
 0x171   : > { %1887 = vmatprep.subr.bf16.mxu0 %v2036_v12  ;;  %1893 = vmatprep.subr.bf16.mxu1 %v2036_v12 }
 0x176   : > { %1878 = vmatmul.mubr.msk.bf16.vlgmr.msra.gmra.mxu0 %vm1030_vm4, %v1020_v29  ;;  %1884 = vmatmul.mubr.msk.bf16.vlgmr.msra.gmra.mxu1 %vm1030_vm4, %v1021_v28  ;;  %v1515_v28 = vld [vmem:[%s2309_s6 + $0x8] sm:$0xff]  ;;  %v1516_v29 = vld [vmem:[%s2309_s6 + $0x10] sm:$0xff] }
 0x177   : > { %1889 = vmatprep.mubr.msk.bf16.mxu0 %vm2037_vm2, %v2036_v12  ;;  %1895 = vmatprep.mubr.msk.bf16.mxu1 %vm2037_vm2, %v2036_v12 }
 0x22e   : > { %v1072_v35 = vpop.f32.mrf.mxu0  ;;  %v1118_v36 = vpop.f32.mrf.mxu1 }
 0x22f   : > { %v1216_v37 = vsel %vm1030_vm4, %v1072_v35, -inf  ;;  %v1219_v42 = vsel %vm1030_vm4, %v1118_v36, -inf }
 0x230   : > { %v1873_v38 = vpop.f32.mrf.mxu1  ;;  %1217 = vmax.xlane.f32.xlu1 %v1216_v37  ;;  %v1867_v39 = vpop.f32.mrf.mxu0 }
 0x232   : > { %v1075_v40 = vpop.f32.mrf.mxu0  ;;  %v1121_v41 = vpop.f32.mrf.mxu1 }
 0x234   : > { %v1874_v43 = vpop.f32.mrf.mxu1  ;;  %1220 = vmax.xlane.f32.xlu1 %v1219_v42  ;;  %v1868_v44 = vpop.f32.mrf.mxu0 }
 0x236   : > { %v1164_v45 = vpop.f32.mrf.mxu0  ;;  %v1210_v46 = vpop.f32.mrf.mxu1 }
 0x237   : > { %v1225_v47 = vsel %vm1030_vm4, %v1210_v46, -inf  ;;  %v1222_v48 = vsel %vm1030_vm4, %v1164_v45, -inf }
 0x238   : > { %v1885_v49 = vpop.f32.mrf.mxu1  ;;  %1226 = vmax.xlane.f32.xlu1 %v1225_v47  ;;  %1223 = vmax.xlane.f32.xlu0 %v1222_v48  ;;  %v1879_v50 = vpop.f32.mrf.mxu0 }
 0x23a   : > { %v1167_v51 = vpop.f32.mrf.mxu0  ;;  %v1213_v52 = vpop.f32.mrf.mxu1 }
 0x23c   : > { %v1880_v53 = vpop.f32.mrf.mxu0  ;;  %v1886_v54 = vpop.f32.mrf.mxu1 }
 0x249   : > { %854 = vperm.xlu1 %1960, %v840_v55  }
 0x24d   : > { %859 = vperm.xlu1 %1960, %v841_v56   ;;  %v1448_v56 = vlaneseq }
 0x251   : > { %844 = vperm.xlu1 %1960, %v838_v57  }
 0x255   : > { %849 = vperm.xlu1 %1960, %v839_v58  }
 0x2b9   : > { %v1218_v59 = vpop.xlane.xlu1 %1217 }
 0x2ba   : > { %v1228_v60 = vsub.f32 %v1072_v35, %v1218_v59  ;;  %v1514_v35 = vld [vmem:[%s2309_s6] sm:$0xff]  ;;  %v1449_v59 = vand.u32 127, %v1448_v56 }
 0x2bc   : > { %v1232_v61 = vmul.f32 1.442695, %v1228_v60  ;;  %v1451_v60 = vshrl.u32 %v1448_v56, 7 }
 0x2bd   : > { %v1221_v62 = vpop.xlane.xlu1 %1220 }
 0x2be   : > { %1980 = vpow2.f32 %v1232_v61  ;;  %v1229_v63 = vsub.f32 %v1118_v36, %v1221_v62 }
 0x2c0   : > { %v1234_v0 = vmul.f32 1.442695, %v1229_v63 }
 0x2c1   : > { %v1227_v1 = vpop.xlane.xlu1 %1226  ;;  %v1224_v2 = vpop.xlane.xlu0 %1223 }
 0x2c2   : > { %1982 = vpow2.f32 %v1234_v0  ;;  %v1231_v3 = vsub.f32 %v1210_v46, %v1227_v1  ;;  %v1230_v4 = vsub.f32 %v1164_v45, %v1224_v2 }
 0x2c4   : > { %v1238_v5 = vmul.f32 1.442695, %v1231_v3  ;;  %v1236_v6 = vmul.f32 1.442695, %v1230_v4  ;;  %v1452_v4 = vsub.s32 %v1449_v59, %v1451_v60 }
 0x2c5   : > { %v855_v36 = vpop.permute.xlu1 %854 }
 0x2c6   : > { %1984 = vpow2.f32 %v1238_v5  ;;  %v864_v40 = vadd.f32 %v2220_v31, %v855_v36 }
 0x2c7   : > { %1986 = vpow2.f32 %v1236_v6 }
 0x2c8   : > { %v1776_v43 = vmul.f32 -1.442695, %v864_v40 }
 0x2c9   : > { %v860_v37 = vpop.permute.xlu1 %859 }
 0x2ca   : > { %v865_v41 = vadd.f32 %v2224_v33, %v860_v37  ;;  %1988 = vpow2.f32 %v1776_v43 }
 0x2cb   : > { %v1981_v7 = vpop.eup %1980 }
 0x2cc   : > { %v1428_v8 = vsel %vm1030_vm4, %v1981_v7, 0.0  ;;  %v1240_v9 = vpack.c.bf16 %v1981_v7, %v1981_v7  ;;  %v1777_v45 = vmul.f32 -1.442695, %v865_v41 }
 0x2cd   : > { %1429 = vadd.xlane.f32.xlu0 %v1428_v8  ;;  %v845_v38 = vpop.permute.xlu1 %844 }
 0x2ce   : > { %v1248_v10 = vsel %vm1030_vm4, %v1240_v9, 0  ;;  %v862_v44 = vadd.f32 %v845_v38, %v2222_v32  ;;  %1990 = vpow2.f32 %v1777_v45  ;;  %v1979_v38 = vld [vmem:[%s2308_s5 + $0x8] sm:$0xff]  }
 0x2cf   : > { %v1983_v11 = vpop.eup %1982  ;;  %1888 = vmatpush3.bf16.xpose.msra.mxu0 %v1248_v10 }
 0x2d0   : > { %v1241_v13 = vpack.c.bf16 %v1983_v11, %v1983_v11  ;;  %1899 = vmatprep.subr.bf16.mxu0 %v2036_v12  ;;  %v1431_v23 = vsel %vm1030_vm4, %v1983_v11, 0.0  ;;  %v1774_v47 = vmul.f32 -1.442695, %v862_v44 }
 0x2d1   : > { %v850_v39 = vpop.permute.xlu1 %849 }
 0x2d2   : > { %v1294_v14 = vsel %vm1030_vm4, %v1241_v13, 0  ;;  %v863_v42 = vadd.f32 %v850_v39, %v2226_v34 }
 0x2d3   : > { %v1985_v15 = vpop.eup %1984  ;;  %1894 = vmatpush3.bf16.xpose.msra.mxu1 %v1294_v14 }
 0x2d4   : > { %v1987_v16 = vpop.eup %1986  ;;  %v1437_v17 = vsel %vm1030_vm4, %v1985_v15, 0.0  ;;  %1905 = vmatprep.subr.bf16.mxu1 %v2036_v12  ;;  %v1243_v21 = vpack.c.bf16 %v1985_v15, %v1985_v15  ;;  %v1775_v46 = vmul.f32 -1.442695, %v863_v42 }
 0x2d5   : > { %1438 = vadd.xlane.f32.xlu0 %v1437_v17  ;;  %v1434_v18 = vsel %vm1030_vm4, %v1987_v16, 0.0  ;;  %v1242_v20 = vpack.c.bf16 %v1987_v16, %v1987_v16 }
 0x2d6   : > { %1435 = vadd.xlane.f32.xlu1 %v1434_v18  ;;  %1890 = vmatmul.mubr.msk.bf16.vlgmr.msra.gmra.mxu0 %vm1030_vm4, %v1026_v19  ;;  %v1386_v25 = vsel %vm1030_vm4, %v1243_v21, 0  ;;  %1992 = vpow2.f32 %v1775_v46 }
 0x2d7   : > { %v1340_v22 = vsel %vm1030_vm4, %v1242_v20, 0  ;;  %1901 = vmatprep.mubr.msk.bf16.mxu0 %vm2037_vm2, %v2036_v12  ;;  %1994 = vpow2.f32 %v1774_v47  ;;  %v1989_v52 = vpop.eup %1988 }
 0x2d8   : > { %1900 = vmatpush3.bf16.xpose.msra.mxu0 %v1340_v22  ;;  %v880_v34 = vadd.f32 1.0, %v1989_v52 }
 0x2d9   : > { %1432 = vadd.xlane.f32.xlu0 %v1431_v23 }
 0x2da   : > { %1896 = vmatmul.mubr.msk.bf16.vlgmr.msra.gmra.mxu1 %vm1030_vm4, %v1027_v24 }
 0x2db   : > { %1906 = vmatpush3.bf16.xpose.msra.mxu1 %v1386_v25  ;;  %1907 = vmatprep.mubr.msk.bf16.mxu1 %vm2037_vm2, %v2036_v12  ;;  %v1517_v12 = vld [vmem:[%s2309_s6 + $0x18] sm:$0xff]  ;;  %v1991_v31 = vpop.eup %1990 }
 0x2dc   : > { %v881_v53 = vadd.f32 1.0, %v1991_v31 }
 0x2df   : > { %1902 = vmatmul.mubr.msk.bf16.vlgmr.msra.gmra.mxu0 %vm1030_vm4, %v1028_v26 }
 0x2e0   : > { %1915 = vmatprep.mubr.msk.bf16.mxu0 %vm535_vm0, %v1978_v30 }
 0x2e2   : > { %1908 = vmatmul.mubr.msk.bf16.vlgmr.msra.gmra.mxu1 %vm1030_vm4, %v1029_v27 }
 0x2e3   : > { %v1993_v33 = vpop.eup %1992 }
 0x2e4   : > { %v1995_v32 = vpop.eup %1994  ;;  %v879_v54 = vadd.f32 1.0, %v1993_v33 }
 0x2e5   : > { %v878_v55 = vadd.f32 1.0, %v1995_v32 }
 0x2e7   : > { %1525 = vperm.xlu1 %1960, %v1515_v28  }
 0x2eb   : > { %1530 = vperm.xlu1 %1960, %v1516_v29  }
 0x2ef   : > { %1535 = vperm.xlu1 %1960, %v1517_v12   ;;  %1520 = vperm.xlu0 %1961, %v1514_v35  }
 0x356   : > { %v1430_v48 = vpop.xlane.xlu0 %1429 }
 0x35e   : > { %v1439_v49 = vpop.xlane.xlu0 %1438 }
 0x35f   : > { %v1436_v50 = vpop.xlane.xlu1 %1435 }
 0x360   : > { %1996 = vrcp.f32 %v1436_v50 }
 0x362   : > { %v1433_v51 = vpop.xlane.xlu0 %1432 }
 0x363   : > { %1998 = vrcp.f32 %v1433_v51  ;;  %v1526_v39 = vpop.permute.xlu1 %1525 }
 0x364   : > { %2000 = vrcp.f32 %v1430_v48 }
 0x365   : > { %2002 = vrcp.f32 %v1439_v49 }
 0x366   : > { %2004 = vrcp.f32 %v880_v34 }
 0x367   : > { %2006 = vrcp.f32 %v881_v53  ;;  %v1531_v40 = vpop.permute.xlu1 %1530 }
 0x368   : > { %2008 = vrcp.f32 %v879_v54 }
 0x369   : > { %2010 = vrcp.f32 %v878_v55 }
 0x36a   : > { %v1521_v42 = vpop.permute.xlu0 %1520 }
 0x36b   : > { %v1536_v46 = vpop.permute.xlu1 %1535 }
 0x36d   : > { %v1997_v63 = vpop.eup %1996 }
 0x36e   : > { %v1461_v9 = vrot.slane %v1997_v63, %v1452_v4 }
 0x370   : > { %v1999_v0 = vpop.eup %1998 }
 0x371   : > { %v2001_v3 = vpop.eup %2000  ;;  %v1457_v7 = vrot.slane %v1999_v0, %v1452_v4 }
 0x372   : > { %v2003_v5 = vpop.eup %2002  ;;  %v1453_v11 = vrot.slane %v2001_v3, %v1452_v4 }
 0x373   : > { %v1465_v16 = vrot.slane %v2003_v5, %v1452_v4  ;;  %v2005_v17 = vpop.eup %2004 }
 0x374   : > { %v2007_v19 = vpop.eup %2006 }
 0x375   : > { %v2009_v23 = vpop.eup %2008 }
 0x376   : > { %v2011_v29 = vpop.eup %2010 }
 0x396   : > { %v1284_v57 = vpop.f32.mrf.mxu0 }
 0x397   : > { %v1500_v20 = vmul.f32 %v1453_v11, %v1284_v57 }
 0x398   : > { %v1891_v58 = vpop.f32.mrf.mxu0 }
 0x399   : > { %v1504_v30 = vmul.f32 %v2011_v29, %v1500_v20 }
 0x39a   : > { %v1287_v61 = vpop.f32.mrf.mxu0  ;;  %v1330_v62 = vpop.f32.mrf.mxu1 }
 0x39b   : > { %v1501_v13 = vmul.f32 %v1457_v7, %v1330_v62 }
 0x39c   : > { %v1892_v1 = vpop.f32.mrf.mxu0  ;;  %v1897_v2 = vpop.f32.mrf.mxu1 }
 0x39d   : > { %v1505_v25 = vmul.f32 %v2009_v23, %v1501_v13 }
 0x39e   : > { %v1333_v6 = vpop.f32.mrf.mxu1 }
 0x39f   : > { %v1376_v8 = vpop.f32.mrf.mxu0  ;;  %v1512_v37 = vpack.c.bf16 %v1505_v25, %v1504_v30 }
 0x3a0   : > { %v1898_v10 = vpop.f32.mrf.mxu1  ;;  %v1502_v14 = vmul.f32 %v1461_v9, %v1376_v8 }
 0x3a1   : > { %v1903_v15 = vpop.f32.mrf.mxu0 }
 0x3a2   : > { %v1422_v18 = vpop.f32.mrf.mxu1  ;;  %v1506_v26 = vmul.f32 %v2005_v17, %v1502_v14 }
 0x3a3   : > { %v1379_v21 = vpop.f32.mrf.mxu0  ;;  %v1503_v22 = vmul.f32 %v1465_v16, %v1422_v18 }
 0x3a4   : > { %v1909_v24 = vpop.f32.mrf.mxu1 }
 0x3a5   : > { %v1507_v27 = vmul.f32 %v2007_v19, %v1503_v22  ;;  %v1904_v28 = vpop.f32.mrf.mxu0 }
 0x3a6   : > { %v1425_v12 = vpop.f32.mrf.mxu1 }
 0x3a7   : > { %v1513_v35 = vpack.c.bf16 %v1507_v27, %v1506_v26 }
 0x3a8   : > { %v1910_v36 = vpop.f32.mrf.mxu1 }
 0x3a9   : > { %1911 = vmatprep.subr.bf16.mxu0 %v1513_v35 }
 0x3aa   : > { %1912 = vmatpush3.bf16.msra.mxu0 %v1513_v35 }
 0x3ab   : > { %1913 = vmatprep.subr.bf16.mxu0 %v1512_v37 }
 0x3ae   : > { %1914 = vmatpush3.bf16.msra.mxu0 %v1512_v37 }
 0x3b1   : > { %1916 = vmatmul.mubr.msk.bf16.vlgmr.msra.gmra.mxu0 %vm535_vm0, %v1979_v38 }
 0x471   : > { %v1917_v41 = vpop.f32.mrf.mxu0 }
 0x472   : > { %v1597_v43 = vadd.f32 %v1917_v41, %v1531_v40 }
 0x473   : > { %v1588_v44 = vpop.f32.mrf.mxu0 }
 0x474   : > { %1605 = vst.msk [vmem:[%s471_s23 + $0x10] sm:$0xff] %vm1030_vm4, %v1597_v43  ;;  %v1589_v45 = vadd.f32 %v1588_v44, %v1521_v42 }
 0x475   : > { %v1918_v47 = vpop.f32.mrf.mxu0 }
 0x476   : > { %1603 = vst.msk [vmem:[%s471_s23] sm:$0xff] %vm1030_vm4, %v1589_v45  ;;  %v1600_v48 = vadd.f32 %v1918_v47, %v1536_v46 }
 0x477   : > { %v1591_v49 = vpop.f32.mrf.mxu0 }
 0x478   : > { %1606 = vst.msk [vmem:[%s471_s23 + $0x18] sm:$0xff] %vm1030_vm4, %v1600_v48  ;;  %v1592_v50 = vadd.f32 %v1591_v49, %v1526_v39 }
 0x47a   : > { %1604 = vst.msk [vmem:[%s471_s23 + $0x8] sm:$0xff] %vm1030_vm4, %v1592_v50 }
 0x47b PF: > { %s21_s19 = sadd.s32 1, %s2034_s19   ;;  %s2315_s17 = smov %s2030_s18 }
 0x47c   : > { %p18_p5 = scmp.ge.s32.totalorder %s21_s19, 4   ;;  %s2316_s18 = smov %s2318_s20 }
 0x47e   :  { %20 = sbr.rel (!%p18_p5) target bundleno = 2 (0x2), region = 107 }

// kernel: tpu_custom_call.1
= control target key start
LH: loop header
LB: loop body
LE: loop exit
PB: predicated region body
PF: predicated region fallthrough
CT: control target
= control target key end

     0   :  { %s2099_s17 = smov 0   ;;  %s2101_s18 = smov 0   ;;  %s2303_s0 = inlined_call_operand.vmem [shape: bf16[2,32,8], index: 0, kind: input, shape index: {}]   ;;  %s2304_s1 = inlined_call_operand.vmem [shape: bf16[2,32,8], index: 1, kind: input, shape index: {}]   ;;  %s2305_s2 = inlined_call_operand.vmem [shape: bf16[96,32], index: 2, kind: input, shape index: {}]   ;;  %s2306_s3 = inlined_call_operand.vmem [shape: bf16[96,32], index: 3, kind: input, shape index: {}]   ;;  %s2307_s4 = inlined_call_operand.vmem [shape: f32[32,1], index: 4, kind: input, shape index: {}]   ;;  %s2308_s5 = inlined_call_operand.vmem [shape: bf16[32,32], index: 5, kind: input, shape index: {}]   ;;  %s2309_s6 = inlined_call_operand.vmem [shape: f32[32,1], index: 6, kind: input, shape index: {}]   ;;  %s2310_s7 = inlined_call_operand.vmem [shape: f32[8,8], index: 7, kind: input, shape index: {}]   ;;  %s2311_s8 = inlined_call_operand.vmem [shape: f32[8,8], index: 8, kind: input, shape index: {}]   ;;  %s2312_s9 = inlined_call_operand.vmem [shape: f32[8,8], index: 9, kind: input, shape index: {}]   ;;  %s2313_s10 = inlined_call_operand.vmem [shape: f32[8,8], index: 10, kind: input, shape index: {}]   ;;  %s2314_s11 = inlined_call_operand.vmem [shape: f32[2,32,8], index: 11, kind: output, shape index: {}]  }
   0x1   :  { %s2103_s19 = smov 0  }
   0x2 LB: > { %s33_s20 = sadd.s32 1, %s2030_s18  ;;  %p1739_p0 = scmp.ge.s32.totalorder %s2034_s19, 1  ;;  %s2034_s19 = sphi %s2103_s19, %s21_s19   ;;  %s2030_s18 = sphi %s2101_s18, %s2316_s18   ;;  %s2026_s17 = sphi %s2099_s17, %s2315_s17  }
   0x3   : > { %p35_p1 = scmp.ge.s32.totalorder %s33_s20, 2  ;;  %p384_p2 = scmp.lt.s32.totalorder %s2034_s19, 3 }
   0x5   : > { %s2318_s20 = smov (%p35_p1, %s33_s20), 0  ;;  %p385_p3 = pnand %p1739_p0, %p384_p2 }
   0x6   : > { %p443_p4 = scmp.lt.s32.totalorder (!%p385_p3), %s2026_s17, 1 }
   0x7   : > { %388 = sbr.rel (%p385_p3) target bundleno = 1147 (0x47b), region = 64 }
   0xc   : > { %vm535_vm0 = vcmask 261120   ;;  %v1964_v0 = vld [vmem:[%s2306_s3] sm:$0xff]   ;;  %s2320_s17 = smov (!%p443_p4, %s2026_s17), 1  ;;  %v1965_v6 = vld [vmem:[%s2306_s3 + $0x8] sm:$0xff]   ;;  %v1966_v7 = vld [vmem:[%s2306_s3 + $0x10] sm:$0xff]   ;;  %v2036_v12 = vmov 0.0  }
   0xd   : > { %1851 = vmatprep.mubr.msk.bf16.mxu1 %vm535_vm0, %v1964_v0  ;;  %s1792_s23 = sshll.u32 %s2320_s17, 4  ;;  %v1970_v1 = vld [vmem:[%s2305_s2] sm:$0xff]   ;;  %v1971_v8 = vld [vmem:[%s2305_s2 + $0x8] sm:$0xff]   ;;  %v1972_v9 = vld [vmem:[%s2305_s2 + $0x10] sm:$0xff]   ;;  %vm653_vm1 = vcmask 60416   ;;  %vm2037_vm2 = vmmov 0  }
   0xe   : > { %s455_s26 = scalar_lea.vmem %s2304_s1, %s1792_s23  ;;  %s447_s29 = scalar_lea.vmem %s2303_s0, %s1792_s23  ;;  %1835 = vmatprep.mubr.msk.bf16.mxu0 %vm535_vm0, %v1970_v1  ;;  %v1967_v10 = vld [vmem:[%s2306_s3 + $0x18] sm:$0xff]   ;;  %v1974_v13 = vld [vmem:[%s2305_s2 + $0x20] sm:$0xff]   ;;  %v1975_v14 = vld [vmem:[%s2305_s2 + $0x28] sm:$0xff]   ;;  %vm1034_vm3 = vcmask 1043456   ;;  %vm1030_vm4 = vcmask 64512  }
   0xf   : > { %v1962_v2 = vld [vmem:[%s455_s26 + $0x8] sm:$0xff]   ;;  %v1963_v3 = vld [vmem:[%s455_s26] sm:$0xff]   ;;  %v1973_v11 = vld [vmem:[%s2305_s2 + $0x18] sm:$0xff]   ;;  %s1794_s16 = sshll.u32 %s2320_s17, 5 }
  0x10   : > { %1847 = vmatprep.subr.bf16.mxu1 %v1962_v2  ;;  %v1968_v4 = vld [vmem:[%s447_s29 + $0x8] sm:$0xff]   ;;  %v1969_v5 = vld [vmem:[%s447_s29] sm:$0xff]   ;;  %s471_s23 = scalar_lea.vmem %s2314_s11, %s1794_s16 }
  0x11   : > { %1848 = vmatpush3.bf16.msra.mxu1 %v1962_v2  ;;  %1831 = vmatprep.subr.bf16.mxu0 %v1968_v4  ;;  %v1976_v15 = vld [vmem:[%s2306_s3 + $0x20] sm:$0xff]   ;;  %v1977_v16 = vld [vmem:[%s2306_s3 + $0x28] sm:$0xff]  }
  0x12   : > { %1849 = vmatprep.subr.bf16.mxu1 %v1963_v3  ;;  %1832 = vmatpush3.bf16.msra.mxu0 %v1968_v4  ;;  %v635_v23 = vld [vmem:[%s2310_s7] sm:$0xff] }
  0x13   : > { %1833 = vmatprep.subr.bf16.mxu0 %v1969_v5  ;;  %v636_v27 = vld [vmem:[%s2311_s8] sm:$0xff] }
  0x14   : > { %v825_v33 = vld [vmem:[%s2313_s10] sm:$0xff] }
  0x15   : > { %1850 = vmatpush3.bf16.msra.mxu1 %v1963_v3  ;;  %v824_v36 = vld [vmem:[%s2312_s9] sm:$0xff] }
  0x16   : > { %1834 = vmatpush3.bf16.msra.mxu0 %v1969_v5  ;;  %1869 = vmatprep.subr.bf16.mxu1 %v2036_v12 }
  0x17   : > { %1863 = vmatprep.subr.bf16.mxu0 %v2036_v12 }
  0x18   : > { %1852 = vmatmul.mubr.msk.bf16.vlgmr.msra.gmra.mxu1 %vm535_vm0, %v1965_v6 }
  0x19   : > { %1855 = vmatprep.mubr.msk.bf16.mxu1 %vm535_vm0, %v1966_v7  ;;  %1836 = vmatmul.mubr.msk.bf16.vlgmr.msra.gmra.mxu0 %vm535_vm0, %v1971_v8 }
  0x1a   : > { %1839 = vmatprep.mubr.msk.bf16.mxu0 %vm535_vm0, %v1972_v9 }
  0x20   : > { %1856 = vmatmul.mubr.msk.bf16.gmra.mxu1 %vm535_vm0, %v1967_v10 }
  0x21   : > { %1840 = vmatmul.mubr.msk.bf16.gmra.mxu0 %vm535_vm0, %v1973_v11  ;;  %1859 = vmatprep.mubr.msk.bf16.mxu1 %vm535_vm0, %v1976_v15 }
  0x22   : > { %1843 = vmatprep.mubr.msk.bf16.mxu0 %vm535_vm0, %v1974_v13 }
  0x28   : > { %1860 = vmatmul.mubr.msk.bf16.gmra.mxu1 %vm535_vm0, %v1977_v16 }
  0x29   : > { %1844 = vmatmul.mubr.msk.bf16.gmra.mxu0 %vm535_vm0, %v1975_v14  ;;  %1871 = vmatprep.mubr.msk.bf16.mxu1 %vm2037_vm2, %v2036_v12 }
  0x2a   : > { %1865 = vmatprep.mubr.msk.bf16.mxu0 %vm2037_vm2, %v2036_v12 }
  0xd8   : > { %v1853_v17 = vpop.f32.mrf.mxu1 }
  0xd9   : > { %v1837_v19 = vpop.f32.mrf.mxu0  ;;  %v828_v59 = vmul.f32 %v1853_v17, %v824_v36 }
  0xda   : > { %v777_v18 = vpop.f32.mrf.mxu1  ;;  %v639_v28 = vmul.f32 %v1837_v19, %v635_v23 }
  0xdb   : > { %v588_v21 = vpop.f32.mrf.mxu0  ;;  %v826_v40 = vmul.f32 %v824_v36, %v777_v18 }
  0xdc   : > { %v1854_v20 = vpop.f32.mrf.mxu1  ;;  %v637_v31 = vmul.f32 %v635_v23, %v588_v21 }
  0xdd   : > { %v1838_v24 = vpop.f32.mrf.mxu0  ;;  %v829_v50 = vmul.f32 %v1854_v20, %v824_v36 }
  0xde   : > { %v780_v22 = vpop.f32.mrf.mxu1  ;;  %v640_v43 = vmul.f32 %v1838_v24, %v635_v23 }
  0xdf   : > { %v591_v26 = vpop.f32.mrf.mxu0  ;;  %v827_v41 = vmul.f32 %v824_v36, %v780_v22 }
  0xe0   : > { %v1857_v25 = vpop.f32.mrf.mxu1  ;;  %v638_v44 = vmul.f32 %v635_v23, %v591_v26 }
  0xe1   : > { %v1841_v30 = vpop.f32.mrf.mxu0  ;;  %v832_v51 = vmul.f32 %v1857_v25, %v825_v33 }
  0xe2   : > { %v793_v29 = vpop.f32.mrf.mxu1  ;;  %v643_v32 = vmul.f32 %v1841_v30, %v636_v27  ;;  %v2038_v30 = vmov 0  }
  0xe3   : > { %v604_v35 = vpop.f32.mrf.mxu0  ;;  %v830_v37 = vmul.f32 %v825_v33, %v793_v29  ;;  %v836_v0 = vadd.f32 %v832_v51, %v828_v59  ;;  %1960 = vset.pattern.permute.xlu1 %v2038_v30 }
  0xe4   : > { %v1858_v34 = vpop.f32.mrf.mxu1  ;;  %v647_v38 = vadd.f32 %v643_v32, %v639_v28  ;;  %v641_v39 = vmul.f32 %v636_v27, %v604_v35 }
  0xe5   : > { %v1842_v45 = vpop.f32.mrf.mxu0  ;;  %v833_v46 = vmul.f32 %v1858_v34, %v825_v33  ;;  %v834_v54 = vadd.f32 %v830_v37, %v826_v40 }
  0xe6   : > { %v796_v42 = vpop.f32.mrf.mxu1  ;;  %v651_v48 = vpack.c.bf16 %v647_v38, %v647_v38  ;;  %v645_v49 = vadd.f32 %v641_v39, %v637_v31  ;;  %v644_v52 = vmul.f32 %v1842_v45, %v636_v27 }
  0xe7   : > { %v831_v47 = vmul.f32 %v825_v33, %v796_v42  ;;  %v607_v53 = vpop.f32.mrf.mxu0  ;;  %v837_v60 = vadd.f32 %v833_v46, %v829_v50 }
  0xe8   : > { %656 = vst.msk [vmem:[#allocation2 + $0x8] sm:$0xf] %vm653_vm1, %v651_v48  ;;  %v649_v56 = vpack.c.bf16 %v645_v49, %v645_v49  ;;  %v642_v57 = vmul.f32 %v636_v27, %v607_v53  ;;  %v648_v58 = vadd.f32 %v644_v52, %v640_v43  ;;  %v2220_v31 = vpop.f32.mrf.mxu1 }
  0xe9   : > { %v835_v55 = vadd.f32 %v831_v47, %v827_v41  ;;  %v1953_v2 = vpack.i.bf16 %v837_v60, %v836_v0  ;;  %v1845_v7 = vpop.f32.mrf.mxu0 }
  0xea   : > { %654 = vst.msk [vmem:[#allocation2] sm:$0xf] %vm653_vm1, %v649_v56  ;;  %v646_v62 = vadd.f32 %v642_v57, %v638_v44  ;;  %v652_v63 = vpack.c.bf16 %v648_v58, %v648_v58  ;;  %v660_v8 = vpack.c.bf16 %v1845_v7, %v1845_v7  ;;  %v2222_v32 = vpop.f32.mrf.mxu1  ;;  %v841_v56 = vld [vmem:[%s2307_s4 + $0x18] sm:$0xff]  ;;  %v838_v57 = vld [vmem:[%s2307_s4] sm:$0xff]  ;;  %v839_v58 = vld [vmem:[%s2307_s4 + $0x8] sm:$0xff] }
  0xeb   : > { %v1946_v61 = vpack.i.bf16 %v835_v55, %v834_v54  ;;  %v620_v9 = vpop.f32.mrf.mxu0  ;;  %v840_v55 = vld [vmem:[%s2307_s4 + $0x10] sm:$0xff] }
  0xec   : > { %v650_v1 = vpack.c.bf16 %v646_v62, %v646_v62  ;;  %657 = vst.msk [vmem:[#allocation2 + $0xc] sm:$0xf] %vm653_vm1, %v652_v63  ;;  %664 = vst.msk [vmem:[#allocation3 + $0x8] sm:$0xf] %vm653_vm1, %v660_v8  ;;  %v658_v10 = vpack.c.bf16 %v620_v9, %v620_v9  ;;  %v2224_v33 = vpop.f32.mrf.mxu1 }
  0xed   : > { %1947 = vxpose.xlu0.b32.start.end [1/1] (short) (narrow) %v1946_v61, 8  ;;  %v1846_v11 = vpop.f32.mrf.mxu0 }
  0xee   : > { %655 = vst.msk [vmem:[#allocation2 + $0x4] sm:$0xf] %vm653_vm1, %v650_v1  ;;  %662 = vst.msk [vmem:[#allocation3] sm:$0xf] %vm653_vm1, %v658_v10  ;;  %v661_v13 = vpack.c.bf16 %v1846_v11, %v1846_v11  ;;  %v2226_v34 = vpop.f32.mrf.mxu1 }
  0xef   : > { %v623_v14 = vpop.f32.mrf.mxu0  ;;  %v1024_v19 = vld [vmem:[#allocation2 + $0x8] sm:$0xf] }
  0xf0   : > { %665 = vst.msk [vmem:[#allocation3 + $0xc] sm:$0xf] %vm653_vm1, %v661_v13  ;;  %v659_v15 = vpack.c.bf16 %v623_v14, %v623_v14  ;;  %v1128_v23 = vsel %vm1034_vm3, %v1024_v19, 0 }
  0xf1   : > { %1954 = vxpose.xlu0.b32.start.end [1/1] (short) (narrow) %v1953_v2, 8  ;;  %v1022_v3 = vld [vmem:[#allocation2] sm:$0xf] }
  0xf2   : > { %v1036_v4 = vsel %vm1034_vm3, %v1022_v3, 0  ;;  %663 = vst.msk [vmem:[#allocation3 + $0x4] sm:$0xf] %vm653_vm1, %v659_v15 }
  0xf3   : > { %1864 = vmatpush3.bf16.msra.mxu0 %v1036_v4  ;;  %v1025_v20 = vld [vmem:[#allocation2 + $0xc] sm:$0xf] }
  0xf4   : > { %1875 = vmatprep.subr.bf16.mxu0 %v2036_v12  ;;  %v1174_v24 = vsel %vm1034_vm3, %v1025_v20, 0 }
  0xf5   : > { %v1023_v5 = vld [vmem:[#allocation2 + $0x4] sm:$0xf]  ;;  %v1026_v19 = vld [vmem:[#allocation3] sm:$0xf] }
  0xf6   : > { %v1082_v6 = vsel %vm1034_vm3, %v1023_v5, 0 }
  0xf7   : > { %1870 = vmatpush3.bf16.msra.mxu1 %v1082_v6 }
  0xf8   : > { %1881 = vmatprep.subr.bf16.mxu1 %v2036_v12 }
 0x11a   : > { %1961 = vset.pattern.permute.xlu0 %v2038_v30  ;;  %v1978_v30 = vld [vmem:[%s2308_s5] sm:$0xff]  }
 0x169   : > { %v1948_v16 = vpop.trf.xlu0 }
 0x16a   : > { %v1952_v17 = vunpack.i.h.bf16 %v1948_v16  ;;  %v1949_v18 = vunpack.i.l.bf16 %v1948_v16 }
 0x16c   : > { %v1019_v21 = vpack.c.bf16 %v1952_v17, %v1952_v17  ;;  %v1018_v22 = vpack.c.bf16 %v1949_v18, %v1949_v18 }
 0x16d   : > { %v1955_v25 = vpop.trf.xlu0 }
 0x16e   : > { %1866 = vmatmul.mubr.msk.bf16.vlgmr.msra.gmra.mxu0 %vm1030_vm4, %v1018_v22  ;;  %1872 = vmatmul.mubr.msk.bf16.vlgmr.msra.gmra.mxu1 %vm1030_vm4, %v1019_v21  ;;  %v1959_v26 = vunpack.i.h.bf16 %v1955_v25  ;;  %v1956_v27 = vunpack.i.l.bf16 %v1955_v25 }
 0x16f   : > { %1876 = vmatpush3.bf16.msra.mxu0 %v1128_v23  ;;  %1882 = vmatpush3.bf16.msra.mxu1 %v1174_v24  ;;  %v1027_v24 = vld [vmem:[#allocation3 + $0x4] sm:$0xf] }
 0x170   : > { %1877 = vmatprep.mubr.msk.bf16.mxu0 %vm2037_vm2, %v2036_v12  ;;  %1883 = vmatprep.mubr.msk.bf16.mxu1 %vm2037_vm2, %v2036_v12  ;;  %v1021_v28 = vpack.c.bf16 %v1959_v26, %v1959_v26  ;;  %v1020_v29 = vpack.c.bf16 %v1956_v27, %v1956_v27  ;;  %v1028_v26 = vld [vmem:[#allocation3 + $0x8] sm:$0xf]  ;;  %v1029_v27 = vld [vmem:[#allocation3 + $0xc] sm:$0xf] }
 0x171   : > { %1887 = vmatprep.subr.bf16.mxu0 %v2036_v12  ;;  %1893 = vmatprep.subr.bf16.mxu1 %v2036_v12 }
 0x176   : > { %1878 = vmatmul.mubr.msk.bf16.vlgmr.msra.gmra.mxu0 %vm1030_vm4, %v1020_v29  ;;  %1884 = vmatmul.mubr.msk.bf16.vlgmr.msra.gmra.mxu1 %vm1030_vm4, %v1021_v28  ;;  %v1515_v28 = vld [vmem:[%s2309_s6 + $0x8] sm:$0xff]  ;;  %v1516_v29 = vld [vmem:[%s2309_s6 + $0x10] sm:$0xff] }
 0x177   : > { %1889 = vmatprep.mubr.msk.bf16.mxu0 %vm2037_vm2, %v2036_v12  ;;  %1895 = vmatprep.mubr.msk.bf16.mxu1 %vm2037_vm2, %v2036_v12 }
 0x22e   : > { %v1072_v35 = vpop.f32.mrf.mxu0  ;;  %v1118_v36 = vpop.f32.mrf.mxu1 }
 0x22f   : > { %v1216_v37 = vsel %vm1030_vm4, %v1072_v35, -inf  ;;  %v1219_v42 = vsel %vm1030_vm4, %v1118_v36, -inf }
 0x230   : > { %v1873_v38 = vpop.f32.mrf.mxu1  ;;  %1217 = vmax.xlane.f32.xlu1 %v1216_v37  ;;  %v1867_v39 = vpop.f32.mrf.mxu0 }
 0x232   : > { %v1075_v40 = vpop.f32.mrf.mxu0  ;;  %v1121_v41 = vpop.f32.mrf.mxu1 }
 0x234   : > { %v1874_v43 = vpop.f32.mrf.mxu1  ;;  %1220 = vmax.xlane.f32.xlu1 %v1219_v42  ;;  %v1868_v44 = vpop.f32.mrf.mxu0 }
 0x236   : > { %v1164_v45 = vpop.f32.mrf.mxu0  ;;  %v1210_v46 = vpop.f32.mrf.mxu1 }
 0x237   : > { %v1225_v47 = vsel %vm1030_vm4, %v1210_v46, -inf  ;;  %v1222_v48 = vsel %vm1030_vm4, %v1164_v45, -inf }
 0x238   : > { %v1885_v49 = vpop.f32.mrf.mxu1  ;;  %1226 = vmax.xlane.f32.xlu1 %v1225_v47  ;;  %1223 = vmax.xlane.f32.xlu0 %v1222_v48  ;;  %v1879_v50 = vpop.f32.mrf.mxu0 }
 0x23a   : > { %v1167_v51 = vpop.f32.mrf.mxu0  ;;  %v1213_v52 = vpop.f32.mrf.mxu1 }
 0x23c   : > { %v1880_v53 = vpop.f32.mrf.mxu0  ;;  %v1886_v54 = vpop.f32.mrf.mxu1 }
 0x249   : > { %854 = vperm.xlu1 %1960, %v840_v55  }
 0x24d   : > { %859 = vperm.xlu1 %1960, %v841_v56   ;;  %v1448_v56 = vlaneseq }
 0x251   : > { %844 = vperm.xlu1 %1960, %v838_v57  }
 0x255   : > { %849 = vperm.xlu1 %1960, %v839_v58  }
 0x2b9   : > { %v1218_v59 = vpop.xlane.xlu1 %1217 }
 0x2ba   : > { %v1228_v60 = vsub.f32 %v1072_v35, %v1218_v59  ;;  %v1514_v35 = vld [vmem:[%s2309_s6] sm:$0xff]  ;;  %v1449_v59 = vand.u32 127, %v1448_v56 }
 0x2bc   : > { %v1232_v61 = vmul.f32 1.442695, %v1228_v60  ;;  %v1451_v60 = vshrl.u32 %v1448_v56, 7 }
 0x2bd   : > { %v1221_v62 = vpop.xlane.xlu1 %1220 }
 0x2be   : > { %1980 = vpow2.f32 %v1232_v61  ;;  %v1229_v63 = vsub.f32 %v1118_v36, %v1221_v62 }
 0x2c0   : > { %v1234_v0 = vmul.f32 1.442695, %v1229_v63 }
 0x2c1   : > { %v1227_v1 = vpop.xlane.xlu1 %1226  ;;  %v1224_v2 = vpop.xlane.xlu0 %1223 }
 0x2c2   : > { %1982 = vpow2.f32 %v1234_v0  ;;  %v1231_v3 = vsub.f32 %v1210_v46, %v1227_v1  ;;  %v1230_v4 = vsub.f32 %v1164_v45, %v1224_v2 }
 0x2c4   : > { %v1238_v5 = vmul.f32 1.442695, %v1231_v3  ;;  %v1236_v6 = vmul.f32 1.442695, %v1230_v4  ;;  %v1452_v4 = vsub.s32 %v1449_v59, %v1451_v60 }
 0x2c5   : > { %v855_v36 = vpop.permute.xlu1 %854 }
 0x2c6   : > { %1984 = vpow2.f32 %v1238_v5  ;;  %v864_v40 = vadd.f32 %v2220_v31, %v855_v36 }
 0x2c7   : > { %1986 = vpow2.f32 %v1236_v6 }
 0x2c8   : > { %v1776_v43 = vmul.f32 -1.442695, %v864_v40 }
 0x2c9   : > { %v860_v37 = vpop.permute.xlu1 %859 }
 0x2ca   : > { %v865_v41 = vadd.f32 %v2224_v33, %v860_v37  ;;  %1988 = vpow2.f32 %v1776_v43 }
 0x2cb   : > { %v1981_v7 = vpop.eup %1980 }
 0x2cc   : > { %v1428_v8 = vsel %vm1030_vm4, %v1981_v7, 0.0  ;;  %v1240_v9 = vpack.c.bf16 %v1981_v7, %v1981_v7  ;;  %v1777_v45 = vmul.f32 -1.442695, %v865_v41 }
 0x2cd   : > { %1429 = vadd.xlane.f32.xlu0 %v1428_v8  ;;  %v845_v38 = vpop.permute.xlu1 %844 }
 0x2ce   : > { %v1248_v10 = vsel %vm1030_vm4, %v1240_v9, 0  ;;  %v862_v44 = vadd.f32 %v845_v38, %v2222_v32  ;;  %1990 = vpow2.f32 %v1777_v45  ;;  %v1979_v38 = vld [vmem:[%s2308_s5 + $0x8] sm:$0xff]  }
 0x2cf   : > { %v1983_v11 = vpop.eup %1982  ;;  %1888 = vmatpush3.bf16.xpose.msra.mxu0 %v1248_v10 }
 0x2d0   : > { %v1241_v13 = vpack.c.bf16 %v1983_v11, %v1983_v11  ;;  %1899 = vmatprep.subr.bf16.mxu0 %v2036_v12  ;;  %v1431_v23 = vsel %vm1030_vm4, %v1983_v11, 0.0  ;;  %v1774_v47 = vmul.f32 -1.442695, %v862_v44 }
 0x2d1   : > { %v850_v39 = vpop.permute.xlu1 %849 }
 0x2d2   : > { %v1294_v14 = vsel %vm1030_vm4, %v1241_v13, 0  ;;  %v863_v42 = vadd.f32 %v850_v39, %v2226_v34 }
 0x2d3   : > { %v1985_v15 = vpop.eup %1984  ;;  %1894 = vmatpush3.bf16.xpose.msra.mxu1 %v1294_v14 }
 0x2d4   : > { %v1987_v16 = vpop.eup %1986  ;;  %v1437_v17 = vsel %vm1030_vm4, %v1985_v15, 0.0  ;;  %1905 = vmatprep.subr.bf16.mxu1 %v2036_v12  ;;  %v1243_v21 = vpack.c.bf16 %v1985_v15, %v1985_v15  ;;  %v1775_v46 = vmul.f32 -1.442695, %v863_v42 }
 0x2d5   : > { %1438 = vadd.xlane.f32.xlu0 %v1437_v17  ;;  %v1434_v18 = vsel %vm1030_vm4, %v1987_v16, 0.0  ;;  %v1242_v20 = vpack.c.bf16 %v1987_v16, %v1987_v16 }
 0x2d6   : > { %1435 = vadd.xlane.f32.xlu1 %v1434_v18  ;;  %1890 = vmatmul.mubr.msk.bf16.vlgmr.msra.gmra.mxu0 %vm1030_vm4, %v1026_v19  ;;  %v1386_v25 = vsel %vm1030_vm4, %v1243_v21, 0  ;;  %1992 = vpow2.f32 %v1775_v46 }
 0x2d7   : > { %v1340_v22 = vsel %vm1030_vm4, %v1242_v20, 0  ;;  %1901 = vmatprep.mubr.msk.bf16.mxu0 %vm2037_vm2, %v2036_v12  ;;  %1994 = vpow2.f32 %v1774_v47  ;;  %v1989_v52 = vpop.eup %1988 }
 0x2d8   : > { %1900 = vmatpush3.bf16.xpose.msra.mxu0 %v1340_v22  ;;  %v880_v34 = vadd.f32 1.0, %v1989_v52 }
 0x2d9   : > { %1432 = vadd.xlane.f32.xlu0 %v1431_v23 }
 0x2da   : > { %1896 = vmatmul.mubr.msk.bf16.vlgmr.msra.gmra.mxu1 %vm1030_vm4, %v1027_v24 }
 0x2db   : > { %1906 = vmatpush3.bf16.xpose.msra.mxu1 %v1386_v25  ;;  %1907 = vmatprep.mubr.msk.bf16.mxu1 %vm2037_vm2, %v2036_v12  ;;  %v1517_v12 = vld [vmem:[%s2309_s6 + $0x18] sm:$0xff]  ;;  %v1991_v31 = vpop.eup %1990 }
 0x2dc   : > { %v881_v53 = vadd.f32 1.0, %v1991_v31 }
 0x2df   : > { %1902 = vmatmul.mubr.msk.bf16.vlgmr.msra.gmra.mxu0 %vm1030_vm4, %v1028_v26 }
 0x2e0   : > { %1915 = vmatprep.mubr.msk.bf16.mxu0 %vm535_vm0, %v1978_v30 }
 0x2e2   : > { %1908 = vmatmul.mubr.msk.bf16.vlgmr.msra.gmra.mxu1 %vm1030_vm4, %v1029_v27 }
 0x2e3   : > { %v1993_v33 = vpop.eup %1992 }
 0x2e4   : > { %v1995_v32 = vpop.eup %1994  ;;  %v879_v54 = vadd.f32 1.0, %v1993_v33 }
 0x2e5   : > { %v878_v55 = vadd.f32 1.0, %v1995_v32 }
 0x2e7   : > { %1525 = vperm.xlu1 %1960, %v1515_v28  }
 0x2eb   : > { %1530 = vperm.xlu1 %1960, %v1516_v29  }
 0x2ef   : > { %1535 = vperm.xlu1 %1960, %v1517_v12   ;;  %1520 = vperm.xlu0 %1961, %v1514_v35  }
 0x356   : > { %v1430_v48 = vpop.xlane.xlu0 %1429 }
 0x35e   : > { %v1439_v49 = vpop.xlane.xlu0 %1438 }
 0x35f   : > { %v1436_v50 = vpop.xlane.xlu1 %1435 }
 0x360   : > { %1996 = vrcp.f32 %v1436_v50 }
 0x362   : > { %v1433_v51 = vpop.xlane.xlu0 %1432 }
 0x363   : > { %1998 = vrcp.f32 %v1433_v51  ;;  %v1526_v39 = vpop.permute.xlu1 %1525 }
 0x364   : > { %2000 = vrcp.f32 %v1430_v48 }
 0x365   : > { %2002 = vrcp.f32 %v1439_v49 }
 0x366   : > { %2004 = vrcp.f32 %v880_v34 }
 0x367   : > { %2006 = vrcp.f32 %v881_v53  ;;  %v1531_v40 = vpop.permute.xlu1 %1530 }
 0x368   : > { %2008 = vrcp.f32 %v879_v54 }
 0x369   : > { %2010 = vrcp.f32 %v878_v55 }
 0x36a   : > { %v1521_v42 = vpop.permute.xlu0 %1520 }
 0x36b   : > { %v1536_v46 = vpop.permute.xlu1 %1535 }
 0x36d   : > { %v1997_v63 = vpop.eup %1996 }
 0x36e   : > { %v1461_v9 = vrot.slane %v1997_v63, %v1452_v4 }
 0x370   : > { %v1999_v0 = vpop.eup %1998 }
 0x371   : > { %v2001_v3 = vpop.eup %2000  ;;  %v1457_v7 = vrot.slane %v1999_v0, %v1452_v4 }
 0x372   : > { %v2003_v5 = vpop.eup %2002  ;;  %v1453_v11 = vrot.slane %v2001_v3, %v1452_v4 }
 0x373   : > { %v1465_v16 = vrot.slane %v2003_v5, %v1452_v4  ;;  %v2005_v17 = vpop.eup %2004 }
 0x374   : > { %v2007_v19 = vpop.eup %2006 }
 0x375   : > { %v2009_v23 = vpop.eup %2008 }
 0x376   : > { %v2011_v29 = vpop.eup %2010 }
 0x396   : > { %v1284_v57 = vpop.f32.mrf.mxu0 }
 0x397   : > { %v1500_v20 = vmul.f32 %v1453_v11, %v1284_v57 }
 0x398   : > { %v1891_v58 = vpop.f32.mrf.mxu0 }
 0x399   : > { %v1504_v30 = vmul.f32 %v2011_v29, %v1500_v20 }
 0x39a   : > { %v1287_v61 = vpop.f32.mrf.mxu0  ;;  %v1330_v62 = vpop.f32.mrf.mxu1 }
 0x39b   : > { %v1501_v13 = vmul.f32 %v1457_v7, %v1330_v62 }
 0x39c   : > { %v1892_v1 = vpop.f32.mrf.mxu0  ;;  %v1897_v2 = vpop.f32.mrf.mxu1 }
 0x39d   : > { %v1505_v25 = vmul.f32 %v2009_v23, %v1501_v13 }
 0x39e   : > { %v1333_v6 = vpop.f32.mrf.mxu1 }
 0x39f   : > { %v1376_v8 = vpop.f32.mrf.mxu0  ;;  %v1512_v37 = vpack.c.bf16 %v1505_v25, %v1504_v30 }
 0x3a0   : > { %v1898_v10 = vpop.f32.mrf.mxu1  ;;  %v1502_v14 = vmul.f32 %v1461_v9, %v1376_v8 }
 0x3a1   : > { %v1903_v15 = vpop.f32.mrf.mxu0 }
 0x3a2   : > { %v1422_v18 = vpop.f32.mrf.mxu1  ;;  %v1506_v26 = vmul.f32 %v2005_v17, %v1502_v14 }
 0x3a3   : > { %v1379_v21 = vpop.f32.mrf.mxu0  ;;  %v1503_v22 = vmul.f32 %v1465_v16, %v1422_v18 }
 0x3a4   : > { %v1909_v24 = vpop.f32.mrf.mxu1 }
 0x3a5   : > { %v1507_v27 = vmul.f32 %v2007_v19, %v1503_v22  ;;  %v1904_v28 = vpop.f32.mrf.mxu0 }
 0x3a6   : > { %v1425_v12 = vpop.f32.mrf.mxu1 }
 0x3a7   : > { %v1513_v35 = vpack.c.bf16 %v1507_v27, %v1506_v26 }
 0x3a8   : > { %v1910_v36 = vpop.f32.mrf.mxu1 }
 0x3a9   : > { %1911 = vmatprep.subr.bf16.mxu0 %v1513_v35 }
 0x3aa   : > { %1912 = vmatpush3.bf16.msra.mxu0 %v1513_v35 }
 0x3ab   : > { %1913 = vmatprep.subr.bf16.mxu0 %v1512_v37 }
 0x3ae   : > { %1914 = vmatpush3.bf16.msra.mxu0 %v1512_v37 }
 0x3b1   : > { %1916 = vmatmul.mubr.msk.bf16.vlgmr.msra.gmra.mxu0 %vm535_vm0, %v1979_v38 }
 0x471   : > { %v1917_v41 = vpop.f32.mrf.mxu0 }
 0x472   : > { %v1597_v43 = vadd.f32 %v1917_v41, %v1531_v40 }
 0x473   : > { %v1588_v44 = vpop.f32.mrf.mxu0 }
 0x474   : > { %1605 = vst.msk [vmem:[%s471_s23 + $0x10] sm:$0xff] %vm1030_vm4, %v1597_v43  ;;  %v1589_v45 = vadd.f32 %v1588_v44, %v1521_v42 }
 0x475   : > { %v1918_v47 = vpop.f32.mrf.mxu0 }
 0x476   : > { %1603 = vst.msk [vmem:[%s471_s23] sm:$0xff] %vm1030_vm4, %v1589_v45  ;;  %v1600_v48 = vadd.f32 %v1918_v47, %v1536_v46 }
 0x477   : > { %v1591_v49 = vpop.f32.mrf.mxu0 }
 0x478   : > { %1606 = vst.msk [vmem:[%s471_s23 + $0x18] sm:$0xff] %vm1030_vm4, %v1600_v48  ;;  %v1592_v50 = vadd.f32 %v1591_v49, %v1526_v39 }
 0x47a   : > { %1604 = vst.msk [vmem:[%s471_s23 + $0x8] sm:$0xff] %vm1030_vm4, %v1592_v50 }
 0x47b PF: > { %s21_s19 = sadd.s32 1, %s2034_s19   ;;  %s2315_s17 = smov %s2030_s18 }
 0x47c   : > { %p18_p5 = scmp.ge.s32.totalorder %s21_s19, 4   ;;  %s2316_s18 = smov %s2318_s20 }
 0x47e   :  { %20 = sbr.rel (!%p18_p5) target bundleno = 2 (0x2), region = 107 }

</bundles_post_ra>
